<compile_context>
chip_gen: v6e
topology: v6e:2x2x1
jax: 0.10.0
libtpu: 0.0.40
codegen_flags: <defaults>
</compile_context>

<pallas_src>
import functools

import jax
import jax.numpy as jnp
import numpy as np
from jax.experimental import pallas as pl
from jax.experimental.pallas import tpu as pltpu


# ------------------------------ Fused kernel ----------------------------------

def _fused_lstm_kernel(num_layers, *refs):
    """refs = (x, W_0, b_0, ..., W_{L-1}, b_{L-1}, W_head, b_head, h0, c0, out)."""
    x_ref = refs[0]
    layer_refs = refs[1:1 + 2 * num_layers]
    wh_ref, bh_ref, h0_ref, c0_ref, out_ref = refs[1 + 2 * num_layers:]

    S, B, _ = x_ref.shape
    H = h0_ref.shape[-1]

    # Hoist all weight / initial-state loads out of the timestep loop.
    Ws = [layer_refs[2 * l][...] for l in range(num_layers)]        # (D_l + H, 4H)
    bs = [layer_refs[2 * l + 1][...] for l in range(num_layers)]    # (1, 4H)
    hs = [h0_ref[l] for l in range(num_layers)]                     # (B, H)
    cs = [c0_ref[l] for l in range(num_layers)]                     # (B, H)

    def cell(xh, w, b, c):
        # One merged MXU matmul per (layer, timestep); gate order i, f, g, o.
        gates = jnp.dot(xh, w, preferred_element_type=jnp.float32) + b   # (B, 4H)
        # NOTE: with 4H == 128 these 32-lane slices each cost a lane relayout;
        # at these shapes the kernel is overhead-bound so we keep the simple
        # form (it becomes free if H is scaled to a multiple of 128).
        i = jax.nn.sigmoid(gates[:, 0:H])
        f = jax.nn.sigmoid(gates[:, H:2 * H])
        g = jnp.tanh(gates[:, 2 * H:3 * H])
        o = jax.nn.sigmoid(gates[:, 3 * H:4 * H])
        c_new = f * c + i * g
        h_new = o * jnp.tanh(c_new)
        return h_new, c_new

    x_all = x_ref[...].astype(jnp.float32)                          # (S, B, D)

    # Fully unrolled recurrence (S is a small static constant) over both layers.
    outs = []
    for t in range(S):
        inp = x_all[t]                                              # (B, D_in)
        for l in range(num_layers):
            xh = jnp.concatenate([inp, hs[l]], axis=1)              # (B, D_l + H)
            hs[l], cs[l] = cell(xh, Ws[l], bs[l], cs[l])
            inp = hs[l]
        outs.append(inp)

    # One lane-dense head matmul over all timesteps at once.
    h_seq = jnp.concatenate(outs, axis=0)                           # (S*B, H)
    head = (jnp.dot(h_seq, wh_ref[...], preferred_element_type=jnp.float32)
            + bh_ref[...])                                          # (S*B, O_pad)
    out_ref[...] = head.reshape(S, B, -1).astype(out_ref.dtype)


def lstm_forward_pallas(prepared, input_seq, h0, c0):
    """input_seq: (S, B, input_size); h0/c0: (num_layers, B, hidden)."""
    S, B, D = input_seq.shape
    num_layers, _, H = h0.shape
    o_pad = prepared["w_head"].shape[1]
    out_size = prepared["output_size"]

    layer_args = []
    in_specs = [pl.BlockSpec((S, B, D), lambda i: (0, 0, 0))]
    for (w, b) in prepared["layers"]:
        layer_args += [w, b]
        in_specs += [pl.BlockSpec(w.shape, lambda i: (0, 0)),
                     pl.BlockSpec(b.shape, lambda i: (0, 0))]
    in_specs += [
        pl.BlockSpec(prepared["w_head"].shape, lambda i: (0, 0)),
        pl.BlockSpec(prepared["b_head"].shape, lambda i: (0, 0)),
        pl.BlockSpec((num_layers, B, H), lambda i: (0, 0, 0)),
        pl.BlockSpec((num_layers, B, H), lambda i: (0, 0, 0)),
    ]

    out_padded = pl.pallas_call(
        functools.partial(_fused_lstm_kernel, num_layers),
        out_shape=jax.ShapeDtypeStruct((S, B, o_pad), input_seq.dtype),
        grid_spec=pltpu.PrefetchScalarGridSpec(
            num_scalar_prefetch=0,
            grid=(1,),
            in_specs=in_specs,
            out_specs=pl.BlockSpec((S, B, o_pad), lambda i: (0, 0, 0)),
        ),
        compiler_params=pltpu.CompilerParams(
            dimension_semantics=("arbitrary",)),
    )(input_seq, *layer_args, prepared["w_head"], prepared["b_head"], h0, c0)

    return out_padded[:, :, :out_size]


# --------------------------- Params (PyTorch layout) ---------------------------

def init_params(key, input_size, hidden_size, num_layers, output_size):
    """Deterministic init mirroring PyTorch's U(-1/sqrt(H), 1/sqrt(H))."""
    params = {"layers": []}
    k = 1.0 / np.sqrt(hidden_size)
    for l in range(num_layers):
        in_dim = input_size if l == 0 else hidden_size
        key, k1, k2, k3, k4 = jax.random.split(key, 5)
        w_ih = jax.random.uniform(k1, (4 * hidden_size, in_dim), jnp.float32, -k, k)
        w_hh = jax.random.uniform(k2, (4 * hidden_size, hidden_size), jnp.float32, -k, k)
        b_ih = jax.random.uniform(k3, (4 * hidden_size,), jnp.float32, -k, k)
        b_hh = jax.random.uniform(k4, (4 * hidden_size,), jnp.float32, -k, k)
        params["layers"].append((w_ih, w_hh, b_ih, b_hh))
    key, k1, k2 = jax.random.split(key, 3)
    params["w_lin"] = jax.random.uniform(k1, (output_size, hidden_size), jnp.float32, -k, k)
    params["b_lin"] = jax.random.uniform(k2, (output_size,), jnp.float32, -k, k)
    return params


def prepare_params(params):
    """One-time weight prep: combined/transposed LSTM weights, lane-padded head."""
    prepared = {"layers": []}
    for (w_ih, w_hh, b_ih, b_hh) in params["layers"]:
        w = jnp.concatenate([w_ih.T, w_hh.T], axis=0)      # (D_in + H, 4H)
        b = (b_ih + b_hh)[None, :]                         # (1, 4H)
        prepared["layers"].append((w, b))
    w_lin, b_lin = params["w_lin"], params["b_lin"]
    O, H = w_lin.shape
    o_pad = -(-O // 128) * 128                             # pad to a full 128-lane slab
    prepared["w_head"] = jnp.zeros((H, o_pad), jnp.float32).at[:, :O].set(w_lin.T)
    prepared["b_head"] = jnp.zeros((1, o_pad), jnp.float32).at[:, :O].set(b_lin)
    prepared["output_size"] = O
    return prepared


# ------------------------------ Pure-JAX reference ------------------------------

def lstm_forward_ref(params, input_seq, h0, c0):
    """Pure-JAX reference (lax.scan) matching torch.nn.LSTM semantics."""
    out = input_seq
    for l, (w_ih, w_hh, b_ih, b_hh) in enumerate(params["layers"]):
        H = w_hh.shape[1]

        def step(carry, x_t, w_ih=w_ih, w_hh=w_hh, b_ih=b_ih, b_hh=b_hh, H=H):
            h, c = carry
            gates = x_t @ w_ih.T + h @ w_hh.T + b_ih + b_hh
            i = jax.nn.sigmoid(gates[:, 0:H])
            f = jax.nn.sigmoid(gates[:, H:2 * H])
            g = jnp.tanh(gates[:, 2 * H:3 * H])
            o = jax.nn.sigmoid(gates[:, 3 * H:4 * H])
            c = f * c + i * g
            h = o * jnp.tanh(c)
            return (h, c), h

        _, out = jax.lax.scan(step, (h0[l], c0[l]), out)
    return out @ params["w_lin"].T + params["b_lin"]


# ------------------------------------ Main ------------------------------------

if __name__ == "__main__":
    input_size, hidden_size, num_layers, output_size = 16, 32, 2, 4
    seq_len, batch = 8, 8

    key = jax.random.PRNGKey(0)
    key, pk, xk, hk, ck = jax.random.split(key, 5)

    params = init_params(pk, input_size, hidden_size, num_layers, output_size)
    prepared = prepare_params(params)

    input_seq = jax.random.normal(xk, (seq_len, batch, input_size), jnp.float32)
    # The PyTorch forward draws h_0/c_0 with torch.randn each call; here they are
    # drawn deterministically from a fixed PRNG key.
    h0 = jax.random.normal(hk, (num_layers, batch, hidden_size), jnp.float32)
    c0 = jax.random.normal(ck, (num_layers, batch, hidden_size), jnp.float32)

    pred = jax.block_until_ready(lstm_forward_pallas(prepared, input_seq, h0, c0))
    ref = jax.block_until_ready(lstm_forward_ref(params, input_seq, h0, c0))

    np.testing.assert_allclose(np.asarray(pred), np.asarray(ref), rtol=2e-5, atol=2e-5)
    assert pred.shape == (seq_len, batch, output_size)
    print("KERNEL_OK")
</pallas_src>

<mosaic_0001>
module attributes {stable_mosaic.version = 11 : i64} {
  func.func @_fused_lstm_kernel(%arg0: i32, %arg1: memref<8x8x16xf32, #tpu.memory_space<vmem>>, %arg2: memref<48x128xf32, #tpu.memory_space<vmem>>, %arg3: memref<1x128xf32, #tpu.memory_space<vmem>>, %arg4: memref<64x128xf32, #tpu.memory_space<vmem>>, %arg5: memref<1x128xf32, #tpu.memory_space<vmem>>, %arg6: memref<32x128xf32, #tpu.memory_space<vmem>>, %arg7: memref<1x128xf32, #tpu.memory_space<vmem>>, %arg8: memref<2x8x32xf32, #tpu.memory_space<vmem>>, %arg9: memref<2x8x32xf32, #tpu.memory_space<vmem>>, %arg10: memref<8x8x128xf32, #tpu.memory_space<vmem>>) attributes {dimension_semantics = [#tpu.dimension_semantics<arbitrary>], iteration_bounds = array<i64: 1>, scalar_prefetch = 0 : i64, scratch_operands = 0 : i64, tpu.core_type = #tpu.core_type<tc>, window_params = [{pipeline_mode = #tpu.pipeline_mode<synchronous>, transform_indices = @transform_0, window_bounds = array<i64: 8, 8, 16>}, {pipeline_mode = #tpu.pipeline_mode<synchronous>, transform_indices = @transform_1, window_bounds = array<i64: 48, 128>}, {pipeline_mode = #tpu.pipeline_mode<synchronous>, transform_indices = @transform_2, window_bounds = array<i64: 1, 128>}, {pipeline_mode = #tpu.pipeline_mode<synchronous>, transform_indices = @transform_3, window_bounds = array<i64: 64, 128>}, {pipeline_mode = #tpu.pipeline_mode<synchronous>, transform_indices = @transform_4, window_bounds = array<i64: 1, 128>}, {pipeline_mode = #tpu.pipeline_mode<synchronous>, transform_indices = @transform_5, window_bounds = array<i64: 32, 128>}, {pipeline_mode = #tpu.pipeline_mode<synchronous>, transform_indices = @transform_6, window_bounds = array<i64: 1, 128>}, {pipeline_mode = #tpu.pipeline_mode<synchronous>, transform_indices = @transform_7, window_bounds = array<i64: 2, 8, 32>}, {pipeline_mode = #tpu.pipeline_mode<synchronous>, transform_indices = @transform_8, window_bounds = array<i64: 2, 8, 32>}, {pipeline_mode = #tpu.pipeline_mode<synchronous>, transform_indices = @transform_9, window_bounds = array<i64: 8, 8, 128>}]} {
    %c0 = arith.constant 0 : index
    %c0_0 = arith.constant 0 : index
    %0 = vector.load %arg2[%c0, %c0_0] : memref<48x128xf32, #tpu.memory_space<vmem>>, vector<48x128xf32>
    %c0_1 = arith.constant 0 : index
    %c0_2 = arith.constant 0 : index
    %1 = vector.load %arg4[%c0_1, %c0_2] : memref<64x128xf32, #tpu.memory_space<vmem>>, vector<64x128xf32>
    %c0_3 = arith.constant 0 : index
    %c0_4 = arith.constant 0 : index
    %2 = vector.load %arg3[%c0_3, %c0_4] : memref<1x128xf32, #tpu.memory_space<vmem>>, vector<1x128xf32>
    %c0_5 = arith.constant 0 : index
    %c0_6 = arith.constant 0 : index
    %3 = vector.load %arg5[%c0_5, %c0_6] : memref<1x128xf32, #tpu.memory_space<vmem>>, vector<1x128xf32>
    %c0_7 = arith.constant 0 : index
    %c0_8 = arith.constant 0 : index
    %c0_9 = arith.constant 0 : index
    %4 = vector.load %arg8[%c0_7, %c0_8, %c0_9] : memref<2x8x32xf32, #tpu.memory_space<vmem>>, vector<1x8x32xf32>
    %5 = vector.shape_cast %4 : vector<1x8x32xf32> to vector<8x32xf32>
    %c1 = arith.constant 1 : index
    %c0_10 = arith.constant 0 : index
    %c0_11 = arith.constant 0 : index
    %6 = vector.load %arg8[%c1, %c0_10, %c0_11] : memref<2x8x32xf32, #tpu.memory_space<vmem>>, vector<1x8x32xf32>
    %7 = vector.shape_cast %6 : vector<1x8x32xf32> to vector<8x32xf32>
    %c0_12 = arith.constant 0 : index
    %c0_13 = arith.constant 0 : index
    %c0_14 = arith.constant 0 : index
    %8 = vector.load %arg9[%c0_12, %c0_13, %c0_14] : memref<2x8x32xf32, #tpu.memory_space<vmem>>, vector<1x8x32xf32>
    %9 = vector.shape_cast %8 : vector<1x8x32xf32> to vector<8x32xf32>
    %c1_15 = arith.constant 1 : index
    %c0_16 = arith.constant 0 : index
    %c0_17 = arith.constant 0 : index
    %10 = vector.load %arg9[%c1_15, %c0_16, %c0_17] : memref<2x8x32xf32, #tpu.memory_space<vmem>>, vector<1x8x32xf32>
    %11 = vector.shape_cast %10 : vector<1x8x32xf32> to vector<8x32xf32>
    %c0_18 = arith.constant 0 : index
    %c0_19 = arith.constant 0 : index
    %c0_20 = arith.constant 0 : index
    %12 = vector.load %arg1[%c0_18, %c0_19, %c0_20] : memref<8x8x16xf32, #tpu.memory_space<vmem>>, vector<8x8x16xf32>
    %13 = vector.extract_strided_slice %12 {offsets = [0, 0, 0], sizes = [1, 8, 16], strides = [1, 1, 1]} : vector<8x8x16xf32> to vector<1x8x16xf32>
    %14 = vector.shape_cast %13 : vector<1x8x16xf32> to vector<8x16xf32>
    %15 = tpu.concatenate %14, %5 in 1 : vector<8x16xf32>, vector<8x32xf32> -> vector<8x48xf32>
    %cst = arith.constant dense<0.000000e+00> : vector<8x128xf32>
    %16 = tpu.matmul %15, %0, %cst {dimension_numbers = #tpu.dot_dimension_numbers<[1], [0], [0], [1], [0, 0, 1, 1], [], []>} : vector<8x48xf32>, vector<48x128xf32>, vector<8x128xf32> -> vector<8x128xf32>
    %17 = vector.broadcast %2 : vector<1x128xf32> to vector<8x128xf32>
    %18 = arith.addf %16, %17 : vector<8x128xf32>
    %19 = vector.extract_strided_slice %18 {offsets = [0, 0], sizes = [8, 32], strides = [1, 1]} : vector<8x128xf32> to vector<8x32xf32>
    %20 = arith.negf %19 : vector<8x32xf32>
    %21 = math.exp %20 : vector<8x32xf32>
    %cst_21 = arith.constant 1.000000e+00 : f32
    %22 = vector.broadcast %cst_21 : f32 to vector<8x32xf32>
    %23 = arith.addf %22, %21 : vector<8x32xf32>
    %24 = arith.divf %22, %23 : vector<8x32xf32>
    %25 = vector.extract_strided_slice %18 {offsets = [0, 32], sizes = [8, 32], strides = [1, 1]} : vector<8x128xf32> to vector<8x32xf32>
    %26 = arith.negf %25 : vector<8x32xf32>
    %27 = math.exp %26 : vector<8x32xf32>
    %cst_22 = arith.constant 1.000000e+00 : f32
    %28 = vector.broadcast %cst_22 : f32 to vector<8x32xf32>
    %29 = arith.addf %28, %27 : vector<8x32xf32>
    %30 = arith.divf %28, %29 : vector<8x32xf32>
    %31 = vector.extract_strided_slice %18 {offsets = [0, 64], sizes = [8, 32], strides = [1, 1]} : vector<8x128xf32> to vector<8x32xf32>
    %32 = math.tanh %31 : vector<8x32xf32>
    %33 = vector.extract_strided_slice %18 {offsets = [0, 96], sizes = [8, 32], strides = [1, 1]} : vector<8x128xf32> to vector<8x32xf32>
    %34 = arith.negf %33 : vector<8x32xf32>
    %35 = math.exp %34 : vector<8x32xf32>
    %cst_23 = arith.constant 1.000000e+00 : f32
    %36 = vector.broadcast %cst_23 : f32 to vector<8x32xf32>
    %37 = arith.addf %36, %35 : vector<8x32xf32>
    %38 = arith.divf %36, %37 : vector<8x32xf32>
    %39 = arith.mulf %30, %9 : vector<8x32xf32>
    %40 = arith.mulf %24, %32 : vector<8x32xf32>
    %41 = arith.addf %39, %40 : vector<8x32xf32>
    %42 = math.tanh %41 : vector<8x32xf32>
    %43 = arith.mulf %38, %42 : vector<8x32xf32>
    %44 = tpu.concatenate %43, %7 in 1 : vector<8x32xf32>, vector<8x32xf32> -> vector<8x64xf32>
    %cst_24 = arith.constant dense<0.000000e+00> : vector<8x128xf32>
    %45 = tpu.matmul %44, %1, %cst_24 {dimension_numbers = #tpu.dot_dimension_numbers<[1], [0], [0], [1], [0, 0, 1, 1], [], []>} : vector<8x64xf32>, vector<64x128xf32>, vector<8x128xf32> -> vector<8x128xf32>
    %46 = vector.broadcast %3 : vector<1x128xf32> to vector<8x128xf32>
    %47 = arith.addf %45, %46 : vector<8x128xf32>
    %48 = vector.extract_strided_slice %47 {offsets = [0, 0], sizes = [8, 32], strides = [1, 1]} : vector<8x128xf32> to vector<8x32xf32>
    %49 = arith.negf %48 : vector<8x32xf32>
    %50 = math.exp %49 : vector<8x32xf32>
    %cst_25 = arith.constant 1.000000e+00 : f32
    %51 = vector.broadcast %cst_25 : f32 to vector<8x32xf32>
    %52 = arith.addf %51, %50 : vector<8x32xf32>
    %53 = arith.divf %51, %52 : vector<8x32xf32>
    %54 = vector.extract_strided_slice %47 {offsets = [0, 32], sizes = [8, 32], strides = [1, 1]} : vector<8x128xf32> to vector<8x32xf32>
    %55 = arith.negf %54 : vector<8x32xf32>
    %56 = math.exp %55 : vector<8x32xf32>
    %cst_26 = arith.constant 1.000000e+00 : f32
    %57 = vector.broadcast %cst_26 : f32 to vector<8x32xf32>
    %58 = arith.addf %57, %56 : vector<8x32xf32>
    %59 = arith.divf %57, %58 : vector<8x32xf32>
    %60 = vector.extract_strided_slice %47 {offsets = [0, 64], sizes = [8, 32], strides = [1, 1]} : vector<8x128xf32> to vector<8x32xf32>
    %61 = math.tanh %60 : vector<8x32xf32>
    %62 = vector.extract_strided_slice %47 {offsets = [0, 96], sizes = [8, 32], strides = [1, 1]} : vector<8x128xf32> to vector<8x32xf32>
    %63 = arith.negf %62 : vector<8x32xf32>
    %64 = math.exp %63 : vector<8x32xf32>
    %cst_27 = arith.constant 1.000000e+00 : f32
    %65 = vector.broadcast %cst_27 : f32 to vector<8x32xf32>
    %66 = arith.addf %65, %64 : vector<8x32xf32>
    %67 = arith.divf %65, %66 : vector<8x32xf32>
    %68 = arith.mulf %59, %11 : vector<8x32xf32>
    %69 = arith.mulf %53, %61 : vector<8x32xf32>
    %70 = arith.addf %68, %69 : vector<8x32xf32>
    %71 = math.tanh %70 : vector<8x32xf32>
    %72 = arith.mulf %67, %71 : vector<8x32xf32>
    %73 = vector.extract_strided_slice %12 {offsets = [1, 0, 0], sizes = [1, 8, 16], strides = [1, 1, 1]} : vector<8x8x16xf32> to vector<1x8x16xf32>
    %74 = vector.shape_cast %73 : vector<1x8x16xf32> to vector<8x16xf32>
    %75 = tpu.concatenate %74, %43 in 1 : vector<8x16xf32>, vector<8x32xf32> -> vector<8x48xf32>
    %cst_28 = arith.constant dense<0.000000e+00> : vector<8x128xf32>
    %76 = tpu.matmul %75, %0, %cst_28 {dimension_numbers = #tpu.dot_dimension_numbers<[1], [0], [0], [1], [0, 0, 1, 1], [], []>} : vector<8x48xf32>, vector<48x128xf32>, vector<8x128xf32> -> vector<8x128xf32>
    %77 = vector.broadcast %2 : vector<1x128xf32> to vector<8x128xf32>
    %78 = arith.addf %76, %77 : vector<8x128xf32>
    %79 = vector.extract_strided_slice %78 {offsets = [0, 0], sizes = [8, 32], strides = [1, 1]} : vector<8x128xf32> to vector<8x32xf32>
    %80 = arith.negf %79 : vector<8x32xf32>
    %81 = math.exp %80 : vector<8x32xf32>
    %cst_29 = arith.constant 1.000000e+00 : f32
    %82 = vector.broadcast %cst_29 : f32 to vector<8x32xf32>
    %83 = arith.addf %82, %81 : vector<8x32xf32>
    %84 = arith.divf %82, %83 : vector<8x32xf32>
    %85 = vector.extract_strided_slice %78 {offsets = [0, 32], sizes = [8, 32], strides = [1, 1]} : vector<8x128xf32> to vector<8x32xf32>
    %86 = arith.negf %85 : vector<8x32xf32>
    %87 = math.exp %86 : vector<8x32xf32>
    %cst_30 = arith.constant 1.000000e+00 : f32
    %88 = vector.broadcast %cst_30 : f32 to vector<8x32xf32>
    %89 = arith.addf %88, %87 : vector<8x32xf32>
    %90 = arith.divf %88, %89 : vector<8x32xf32>
    %91 = vector.extract_strided_slice %78 {offsets = [0, 64], sizes = [8, 32], strides = [1, 1]} : vector<8x128xf32> to vector<8x32xf32>
    %92 = math.tanh %91 : vector<8x32xf32>
    %93 = vector.extract_strided_slice %78 {offsets = [0, 96], sizes = [8, 32], strides = [1, 1]} : vector<8x128xf32> to vector<8x32xf32>
    %94 = arith.negf %93 : vector<8x32xf32>
    %95 = math.exp %94 : vector<8x32xf32>
    %cst_31 = arith.constant 1.000000e+00 : f32
    %96 = vector.broadcast %cst_31 : f32 to vector<8x32xf32>
    %97 = arith.addf %96, %95 : vector<8x32xf32>
    %98 = arith.divf %96, %97 : vector<8x32xf32>
    %99 = arith.mulf %90, %41 : vector<8x32xf32>
    %100 = arith.mulf %84, %92 : vector<8x32xf32>
    %101 = arith.addf %99, %100 : vector<8x32xf32>
    %102 = math.tanh %101 : vector<8x32xf32>
    %103 = arith.mulf %98, %102 : vector<8x32xf32>
    %104 = tpu.concatenate %103, %72 in 1 : vector<8x32xf32>, vector<8x32xf32> -> vector<8x64xf32>
    %cst_32 = arith.constant dense<0.000000e+00> : vector<8x128xf32>
    %105 = tpu.matmul %104, %1, %cst_32 {dimension_numbers = #tpu.dot_dimension_numbers<[1], [0], [0], [1], [0, 0, 1, 1], [], []>} : vector<8x64xf32>, vector<64x128xf32>, vector<8x128xf32> -> vector<8x128xf32>
    %106 = vector.broadcast %3 : vector<1x128xf32> to vector<8x128xf32>
    %107 = arith.addf %105, %106 : vector<8x128xf32>
    %108 = vector.extract_strided_slice %107 {offsets = [0, 0], sizes = [8, 32], strides = [1, 1]} : vector<8x128xf32> to vector<8x32xf32>
    %109 = arith.negf %108 : vector<8x32xf32>
    %110 = math.exp %109 : vector<8x32xf32>
    %cst_33 = arith.constant 1.000000e+00 : f32
    %111 = vector.broadcast %cst_33 : f32 to vector<8x32xf32>
    %112 = arith.addf %111, %110 : vector<8x32xf32>
    %113 = arith.divf %111, %112 : vector<8x32xf32>
    %114 = vector.extract_strided_slice %107 {offsets = [0, 32], sizes = [8, 32], strides = [1, 1]} : vector<8x128xf32> to vector<8x32xf32>
    %115 = arith.negf %114 : vector<8x32xf32>
    %116 = math.exp %115 : vector<8x32xf32>
    %cst_34 = arith.constant 1.000000e+00 : f32
    %117 = vector.broadcast %cst_34 : f32 to vector<8x32xf32>
    %118 = arith.addf %117, %116 : vector<8x32xf32>
    %119 = arith.divf %117, %118 : vector<8x32xf32>
    %120 = vector.extract_strided_slice %107 {offsets = [0, 64], sizes = [8, 32], strides = [1, 1]} : vector<8x128xf32> to vector<8x32xf32>
    %121 = math.tanh %120 : vector<8x32xf32>
    %122 = vector.extract_strided_slice %107 {offsets = [0, 96], sizes = [8, 32], strides = [1, 1]} : vector<8x128xf32> to vector<8x32xf32>
    %123 = arith.negf %122 : vector<8x32xf32>
    %124 = math.exp %123 : vector<8x32xf32>
    %cst_35 = arith.constant 1.000000e+00 : f32
    %125 = vector.broadcast %cst_35 : f32 to vector<8x32xf32>
    %126 = arith.addf %125, %124 : vector<8x32xf32>
    %127 = arith.divf %125, %126 : vector<8x32xf32>
    %128 = arith.mulf %119, %70 : vector<8x32xf32>
    %129 = arith.mulf %113, %121 : vector<8x32xf32>
    %130 = arith.addf %128, %129 : vector<8x32xf32>
    %131 = math.tanh %130 : vector<8x32xf32>
    %132 = arith.mulf %127, %131 : vector<8x32xf32>
    %133 = vector.extract_strided_slice %12 {offsets = [2, 0, 0], sizes = [1, 8, 16], strides = [1, 1, 1]} : vector<8x8x16xf32> to vector<1x8x16xf32>
    %134 = vector.shape_cast %133 : vector<1x8x16xf32> to vector<8x16xf32>
    %135 = tpu.concatenate %134, %103 in 1 : vector<8x16xf32>, vector<8x32xf32> -> vector<8x48xf32>
    %cst_36 = arith.constant dense<0.000000e+00> : vector<8x128xf32>
    %136 = tpu.matmul %135, %0, %cst_36 {dimension_numbers = #tpu.dot_dimension_numbers<[1], [0], [0], [1], [0, 0, 1, 1], [], []>} : vector<8x48xf32>, vector<48x128xf32>, vector<8x128xf32> -> vector<8x128xf32>
    %137 = vector.broadcast %2 : vector<1x128xf32> to vector<8x128xf32>
    %138 = arith.addf %136, %137 : vector<8x128xf32>
    %139 = vector.extract_strided_slice %138 {offsets = [0, 0], sizes = [8, 32], strides = [1, 1]} : vector<8x128xf32> to vector<8x32xf32>
    %140 = arith.negf %139 : vector<8x32xf32>
    %141 = math.exp %140 : vector<8x32xf32>
    %cst_37 = arith.constant 1.000000e+00 : f32
    %142 = vector.broadcast %cst_37 : f32 to vector<8x32xf32>
    %143 = arith.addf %142, %141 : vector<8x32xf32>
    %144 = arith.divf %142, %143 : vector<8x32xf32>
    %145 = vector.extract_strided_slice %138 {offsets = [0, 32], sizes = [8, 32], strides = [1, 1]} : vector<8x128xf32> to vector<8x32xf32>
    %146 = arith.negf %145 : vector<8x32xf32>
    %147 = math.exp %146 : vector<8x32xf32>
    %cst_38 = arith.constant 1.000000e+00 : f32
    %148 = vector.broadcast %cst_38 : f32 to vector<8x32xf32>
    %149 = arith.addf %148, %147 : vector<8x32xf32>
    %150 = arith.divf %148, %149 : vector<8x32xf32>
    %151 = vector.extract_strided_slice %138 {offsets = [0, 64], sizes = [8, 32], strides = [1, 1]} : vector<8x128xf32> to vector<8x32xf32>
    %152 = math.tanh %151 : vector<8x32xf32>
    %153 = vector.extract_strided_slice %138 {offsets = [0, 96], sizes = [8, 32], strides = [1, 1]} : vector<8x128xf32> to vector<8x32xf32>
    %154 = arith.negf %153 : vector<8x32xf32>
    %155 = math.exp %154 : vector<8x32xf32>
    %cst_39 = arith.constant 1.000000e+00 : f32
    %156 = vector.broadcast %cst_39 : f32 to vector<8x32xf32>
    %157 = arith.addf %156, %155 : vector<8x32xf32>
    %158 = arith.divf %156, %157 : vector<8x32xf32>
    %159 = arith.mulf %150, %101 : vector<8x32xf32>
    %160 = arith.mulf %144, %152 : vector<8x32xf32>
    %161 = arith.addf %159, %160 : vector<8x32xf32>
    %162 = math.tanh %161 : vector<8x32xf32>
    %163 = arith.mulf %158, %162 : vector<8x32xf32>
    %164 = tpu.concatenate %163, %132 in 1 : vector<8x32xf32>, vector<8x32xf32> -> vector<8x64xf32>
    %cst_40 = arith.constant dense<0.000000e+00> : vector<8x128xf32>
    %165 = tpu.matmul %164, %1, %cst_40 {dimension_numbers = #tpu.dot_dimension_numbers<[1], [0], [0], [1], [0, 0, 1, 1], [], []>} : vector<8x64xf32>, vector<64x128xf32>, vector<8x128xf32> -> vector<8x128xf32>
    %166 = vector.broadcast %3 : vector<1x128xf32> to vector<8x128xf32>
    %167 = arith.addf %165, %166 : vector<8x128xf32>
    %168 = vector.extract_strided_slice %167 {offsets = [0, 0], sizes = [8, 32], strides = [1, 1]} : vector<8x128xf32> to vector<8x32xf32>
    %169 = arith.negf %168 : vector<8x32xf32>
    %170 = math.exp %169 : vector<8x32xf32>
    %cst_41 = arith.constant 1.000000e+00 : f32
    %171 = vector.broadcast %cst_41 : f32 to vector<8x32xf32>
    %172 = arith.addf %171, %170 : vector<8x32xf32>
    %173 = arith.divf %171, %172 : vector<8x32xf32>
    %174 = vector.extract_strided_slice %167 {offsets = [0, 32], sizes = [8, 32], strides = [1, 1]} : vector<8x128xf32> to vector<8x32xf32>
    %175 = arith.negf %174 : vector<8x32xf32>
    %176 = math.exp %175 : vector<8x32xf32>
    %cst_42 = arith.constant 1.000000e+00 : f32
    %177 = vector.broadcast %cst_42 : f32 to vector<8x32xf32>
    %178 = arith.addf %177, %176 : vector<8x32xf32>
    %179 = arith.divf %177, %178 : vector<8x32xf32>
    %180 = vector.extract_strided_slice %167 {offsets = [0, 64], sizes = [8, 32], strides = [1, 1]} : vector<8x128xf32> to vector<8x32xf32>
    %181 = math.tanh %180 : vector<8x32xf32>
    %182 = vector.extract_strided_slice %167 {offsets = [0, 96], sizes = [8, 32], strides = [1, 1]} : vector<8x128xf32> to vector<8x32xf32>
    %183 = arith.negf %182 : vector<8x32xf32>
    %184 = math.exp %183 : vector<8x32xf32>
    %cst_43 = arith.constant 1.000000e+00 : f32
    %185 = vector.broadcast %cst_43 : f32 to vector<8x32xf32>
    %186 = arith.addf %185, %184 : vector<8x32xf32>
    %187 = arith.divf %185, %186 : vector<8x32xf32>
    %188 = arith.mulf %179, %130 : vector<8x32xf32>
    %189 = arith.mulf %173, %181 : vector<8x32xf32>
    %190 = arith.addf %188, %189 : vector<8x32xf32>
    %191 = math.tanh %190 : vector<8x32xf32>
    %192 = arith.mulf %187, %191 : vector<8x32xf32>
    %193 = vector.extract_strided_slice %12 {offsets = [3, 0, 0], sizes = [1, 8, 16], strides = [1, 1, 1]} : vector<8x8x16xf32> to vector<1x8x16xf32>
    %194 = vector.shape_cast %193 : vector<1x8x16xf32> to vector<8x16xf32>
    %195 = tpu.concatenate %194, %163 in 1 : vector<8x16xf32>, vector<8x32xf32> -> vector<8x48xf32>
    %cst_44 = arith.constant dense<0.000000e+00> : vector<8x128xf32>
    %196 = tpu.matmul %195, %0, %cst_44 {dimension_numbers = #tpu.dot_dimension_numbers<[1], [0], [0], [1], [0, 0, 1, 1], [], []>} : vector<8x48xf32>, vector<48x128xf32>, vector<8x128xf32> -> vector<8x128xf32>
    %197 = vector.broadcast %2 : vector<1x128xf32> to vector<8x128xf32>
    %198 = arith.addf %196, %197 : vector<8x128xf32>
    %199 = vector.extract_strided_slice %198 {offsets = [0, 0], sizes = [8, 32], strides = [1, 1]} : vector<8x128xf32> to vector<8x32xf32>
    %200 = arith.negf %199 : vector<8x32xf32>
    %201 = math.exp %200 : vector<8x32xf32>
    %cst_45 = arith.constant 1.000000e+00 : f32
    %202 = vector.broadcast %cst_45 : f32 to vector<8x32xf32>
    %203 = arith.addf %202, %201 : vector<8x32xf32>
    %204 = arith.divf %202, %203 : vector<8x32xf32>
    %205 = vector.extract_strided_slice %198 {offsets = [0, 32], sizes = [8, 32], strides = [1, 1]} : vector<8x128xf32> to vector<8x32xf32>
    %206 = arith.negf %205 : vector<8x32xf32>
    %207 = math.exp %206 : vector<8x32xf32>
    %cst_46 = arith.constant 1.000000e+00 : f32
    %208 = vector.broadcast %cst_46 : f32 to vector<8x32xf32>
    %209 = arith.addf %208, %207 : vector<8x32xf32>
    %210 = arith.divf %208, %209 : vector<8x32xf32>
    %211 = vector.extract_strided_slice %198 {offsets = [0, 64], sizes = [8, 32], strides = [1, 1]} : vector<8x128xf32> to vector<8x32xf32>
    %212 = math.tanh %211 : vector<8x32xf32>
    %213 = vector.extract_strided_slice %198 {offsets = [0, 96], sizes = [8, 32], strides = [1, 1]} : vector<8x128xf32> to vector<8x32xf32>
    %214 = arith.negf %213 : vector<8x32xf32>
    %215 = math.exp %214 : vector<8x32xf32>
    %cst_47 = arith.constant 1.000000e+00 : f32
    %216 = vector.broadcast %cst_47 : f32 to vector<8x32xf32>
    %217 = arith.addf %216, %215 : vector<8x32xf32>
    %218 = arith.divf %216, %217 : vector<8x32xf32>
    %219 = arith.mulf %210, %161 : vector<8x32xf32>
    %220 = arith.mulf %204, %212 : vector<8x32xf32>
    %221 = arith.addf %219, %220 : vector<8x32xf32>
    %222 = math.tanh %221 : vector<8x32xf32>
    %223 = arith.mulf %218, %222 : vector<8x32xf32>
    %224 = tpu.concatenate %223, %192 in 1 : vector<8x32xf32>, vector<8x32xf32> -> vector<8x64xf32>
    %cst_48 = arith.constant dense<0.000000e+00> : vector<8x128xf32>
    %225 = tpu.matmul %224, %1, %cst_48 {dimension_numbers = #tpu.dot_dimension_numbers<[1], [0], [0], [1], [0, 0, 1, 1], [], []>} : vector<8x64xf32>, vector<64x128xf32>, vector<8x128xf32> -> vector<8x128xf32>
    %226 = vector.broadcast %3 : vector<1x128xf32> to vector<8x128xf32>
    %227 = arith.addf %225, %226 : vector<8x128xf32>
    %228 = vector.extract_strided_slice %227 {offsets = [0, 0], sizes = [8, 32], strides = [1, 1]} : vector<8x128xf32> to vector<8x32xf32>
    %229 = arith.negf %228 : vector<8x32xf32>
    %230 = math.exp %229 : vector<8x32xf32>
    %cst_49 = arith.constant 1.000000e+00 : f32
    %231 = vector.broadcast %cst_49 : f32 to vector<8x32xf32>
    %232 = arith.addf %231, %230 : vector<8x32xf32>
    %233 = arith.divf %231, %232 : vector<8x32xf32>
    %234 = vector.extract_strided_slice %227 {offsets = [0, 32], sizes = [8, 32], strides = [1, 1]} : vector<8x128xf32> to vector<8x32xf32>
    %235 = arith.negf %234 : vector<8x32xf32>
    %236 = math.exp %235 : vector<8x32xf32>
    %cst_50 = arith.constant 1.000000e+00 : f32
    %237 = vector.broadcast %cst_50 : f32 to vector<8x32xf32>
    %238 = arith.addf %237, %236 : vector<8x32xf32>
    %239 = arith.divf %237, %238 : vector<8x32xf32>
    %240 = vector.extract_strided_slice %227 {offsets = [0, 64], sizes = [8, 32], strides = [1, 1]} : vector<8x128xf32> to vector<8x32xf32>
    %241 = math.tanh %240 : vector<8x32xf32>
    %242 = vector.extract_strided_slice %227 {offsets = [0, 96], sizes = [8, 32], strides = [1, 1]} : vector<8x128xf32> to vector<8x32xf32>
    %243 = arith.negf %242 : vector<8x32xf32>
    %244 = math.exp %243 : vector<8x32xf32>
    %cst_51 = arith.constant 1.000000e+00 : f32
    %245 = vector.broadcast %cst_51 : f32 to vector<8x32xf32>
    %246 = arith.addf %245, %244 : vector<8x32xf32>
    %247 = arith.divf %245, %246 : vector<8x32xf32>
    %248 = arith.mulf %239, %190 : vector<8x32xf32>
    %249 = arith.mulf %233, %241 : vector<8x32xf32>
    %250 = arith.addf %248, %249 : vector<8x32xf32>
    %251 = math.tanh %250 : vector<8x32xf32>
    %252 = arith.mulf %247, %251 : vector<8x32xf32>
    %253 = vector.extract_strided_slice %12 {offsets = [4, 0, 0], sizes = [1, 8, 16], strides = [1, 1, 1]} : vector<8x8x16xf32> to vector<1x8x16xf32>
    %254 = vector.shape_cast %253 : vector<1x8x16xf32> to vector<8x16xf32>
    %255 = tpu.concatenate %254, %223 in 1 : vector<8x16xf32>, vector<8x32xf32> -> vector<8x48xf32>
    %cst_52 = arith.constant dense<0.000000e+00> : vector<8x128xf32>
    %256 = tpu.matmul %255, %0, %cst_52 {dimension_numbers = #tpu.dot_dimension_numbers<[1], [0], [0], [1], [0, 0, 1, 1], [], []>} : vector<8x48xf32>, vector<48x128xf32>, vector<8x128xf32> -> vector<8x128xf32>
    %257 = vector.broadcast %2 : vector<1x128xf32> to vector<8x128xf32>
    %258 = arith.addf %256, %257 : vector<8x128xf32>
    %259 = vector.extract_strided_slice %258 {offsets = [0, 0], sizes = [8, 32], strides = [1, 1]} : vector<8x128xf32> to vector<8x32xf32>
    %260 = arith.negf %259 : vector<8x32xf32>
    %261 = math.exp %260 : vector<8x32xf32>
    %cst_53 = arith.constant 1.000000e+00 : f32
    %262 = vector.broadcast %cst_53 : f32 to vector<8x32xf32>
    %263 = arith.addf %262, %261 : vector<8x32xf32>
    %264 = arith.divf %262, %263 : vector<8x32xf32>
    %265 = vector.extract_strided_slice %258 {offsets = [0, 32], sizes = [8, 32], strides = [1, 1]} : vector<8x128xf32> to vector<8x32xf32>
    %266 = arith.negf %265 : vector<8x32xf32>
    %267 = math.exp %266 : vector<8x32xf32>
    %cst_54 = arith.constant 1.000000e+00 : f32
    %268 = vector.broadcast %cst_54 : f32 to vector<8x32xf32>
    %269 = arith.addf %268, %267 : vector<8x32xf32>
    %270 = arith.divf %268, %269 : vector<8x32xf32>
    %271 = vector.extract_strided_slice %258 {offsets = [0, 64], sizes = [8, 32], strides = [1, 1]} : vector<8x128xf32> to vector<8x32xf32>
    %272 = math.tanh %271 : vector<8x32xf32>
    %273 = vector.extract_strided_slice %258 {offsets = [0, 96], sizes = [8, 32], strides = [1, 1]} : vector<8x128xf32> to vector<8x32xf32>
    %274 = arith.negf %273 : vector<8x32xf32>
    %275 = math.exp %274 : vector<8x32xf32>
    %cst_55 = arith.constant 1.000000e+00 : f32
    %276 = vector.broadcast %cst_55 : f32 to vector<8x32xf32>
    %277 = arith.addf %276, %275 : vector<8x32xf32>
    %278 = arith.divf %276, %277 : vector<8x32xf32>
    %279 = arith.mulf %270, %221 : vector<8x32xf32>
    %280 = arith.mulf %264, %272 : vector<8x32xf32>
    %281 = arith.addf %279, %280 : vector<8x32xf32>
    %282 = math.tanh %281 : vector<8x32xf32>
    %283 = arith.mulf %278, %282 : vector<8x32xf32>
    %284 = tpu.concatenate %283, %252 in 1 : vector<8x32xf32>, vector<8x32xf32> -> vector<8x64xf32>
    %cst_56 = arith.constant dense<0.000000e+00> : vector<8x128xf32>
    %285 = tpu.matmul %284, %1, %cst_56 {dimension_numbers = #tpu.dot_dimension_numbers<[1], [0], [0], [1], [0, 0, 1, 1], [], []>} : vector<8x64xf32>, vector<64x128xf32>, vector<8x128xf32> -> vector<8x128xf32>
    %286 = vector.broadcast %3 : vector<1x128xf32> to vector<8x128xf32>
    %287 = arith.addf %285, %286 : vector<8x128xf32>
    %288 = vector.extract_strided_slice %287 {offsets = [0, 0], sizes = [8, 32], strides = [1, 1]} : vector<8x128xf32> to vector<8x32xf32>
    %289 = arith.negf %288 : vector<8x32xf32>
    %290 = math.exp %289 : vector<8x32xf32>
    %cst_57 = arith.constant 1.000000e+00 : f32
    %291 = vector.broadcast %cst_57 : f32 to vector<8x32xf32>
    %292 = arith.addf %291, %290 : vector<8x32xf32>
    %293 = arith.divf %291, %292 : vector<8x32xf32>
    %294 = vector.extract_strided_slice %287 {offsets = [0, 32], sizes = [8, 32], strides = [1, 1]} : vector<8x128xf32> to vector<8x32xf32>
    %295 = arith.negf %294 : vector<8x32xf32>
    %296 = math.exp %295 : vector<8x32xf32>
    %cst_58 = arith.constant 1.000000e+00 : f32
    %297 = vector.broadcast %cst_58 : f32 to vector<8x32xf32>
    %298 = arith.addf %297, %296 : vector<8x32xf32>
    %299 = arith.divf %297, %298 : vector<8x32xf32>
    %300 = vector.extract_strided_slice %287 {offsets = [0, 64], sizes = [8, 32], strides = [1, 1]} : vector<8x128xf32> to vector<8x32xf32>
    %301 = math.tanh %300 : vector<8x32xf32>
    %302 = vector.extract_strided_slice %287 {offsets = [0, 96], sizes = [8, 32], strides = [1, 1]} : vector<8x128xf32> to vector<8x32xf32>
    %303 = arith.negf %302 : vector<8x32xf32>
    %304 = math.exp %303 : vector<8x32xf32>
    %cst_59 = arith.constant 1.000000e+00 : f32
    %305 = vector.broadcast %cst_59 : f32 to vector<8x32xf32>
    %306 = arith.addf %305, %304 : vector<8x32xf32>
    %307 = arith.divf %305, %306 : vector<8x32xf32>
    %308 = arith.mulf %299, %250 : vector<8x32xf32>
    %309 = arith.mulf %293, %301 : vector<8x32xf32>
    %310 = arith.addf %308, %309 : vector<8x32xf32>
    %311 = math.tanh %310 : vector<8x32xf32>
    %312 = arith.mulf %307, %311 : vector<8x32xf32>
    %313 = vector.extract_strided_slice %12 {offsets = [5, 0, 0], sizes = [1, 8, 16], strides = [1, 1, 1]} : vector<8x8x16xf32> to vector<1x8x16xf32>
    %314 = vector.shape_cast %313 : vector<1x8x16xf32> to vector<8x16xf32>
    %315 = tpu.concatenate %314, %283 in 1 : vector<8x16xf32>, vector<8x32xf32> -> vector<8x48xf32>
    %cst_60 = arith.constant dense<0.000000e+00> : vector<8x128xf32>
    %316 = tpu.matmul %315, %0, %cst_60 {dimension_numbers = #tpu.dot_dimension_numbers<[1], [0], [0], [1], [0, 0, 1, 1], [], []>} : vector<8x48xf32>, vector<48x128xf32>, vector<8x128xf32> -> vector<8x128xf32>
    %317 = vector.broadcast %2 : vector<1x128xf32> to vector<8x128xf32>
    %318 = arith.addf %316, %317 : vector<8x128xf32>
    %319 = vector.extract_strided_slice %318 {offsets = [0, 0], sizes = [8, 32], strides = [1, 1]} : vector<8x128xf32> to vector<8x32xf32>
    %320 = arith.negf %319 : vector<8x32xf32>
    %321 = math.exp %320 : vector<8x32xf32>
    %cst_61 = arith.constant 1.000000e+00 : f32
    %322 = vector.broadcast %cst_61 : f32 to vector<8x32xf32>
    %323 = arith.addf %322, %321 : vector<8x32xf32>
    %324 = arith.divf %322, %323 : vector<8x32xf32>
    %325 = vector.extract_strided_slice %318 {offsets = [0, 32], sizes = [8, 32], strides = [1, 1]} : vector<8x128xf32> to vector<8x32xf32>
    %326 = arith.negf %325 : vector<8x32xf32>
    %327 = math.exp %326 : vector<8x32xf32>
    %cst_62 = arith.constant 1.000000e+00 : f32
    %328 = vector.broadcast %cst_62 : f32 to vector<8x32xf32>
    %329 = arith.addf %328, %327 : vector<8x32xf32>
    %330 = arith.divf %328, %329 : vector<8x32xf32>
    %331 = vector.extract_strided_slice %318 {offsets = [0, 64], sizes = [8, 32], strides = [1, 1]} : vector<8x128xf32> to vector<8x32xf32>
    %332 = math.tanh %331 : vector<8x32xf32>
    %333 = vector.extract_strided_slice %318 {offsets = [0, 96], sizes = [8, 32], strides = [1, 1]} : vector<8x128xf32> to vector<8x32xf32>
    %334 = arith.negf %333 : vector<8x32xf32>
    %335 = math.exp %334 : vector<8x32xf32>
    %cst_63 = arith.constant 1.000000e+00 : f32
    %336 = vector.broadcast %cst_63 : f32 to vector<8x32xf32>
    %337 = arith.addf %336, %335 : vector<8x32xf32>
    %338 = arith.divf %336, %337 : vector<8x32xf32>
    %339 = arith.mulf %330, %281 : vector<8x32xf32>
    %340 = arith.mulf %324, %332 : vector<8x32xf32>
    %341 = arith.addf %339, %340 : vector<8x32xf32>
    %342 = math.tanh %341 : vector<8x32xf32>
    %343 = arith.mulf %338, %342 : vector<8x32xf32>
    %344 = tpu.concatenate %343, %312 in 1 : vector<8x32xf32>, vector<8x32xf32> -> vector<8x64xf32>
    %cst_64 = arith.constant dense<0.000000e+00> : vector<8x128xf32>
    %345 = tpu.matmul %344, %1, %cst_64 {dimension_numbers = #tpu.dot_dimension_numbers<[1], [0], [0], [1], [0, 0, 1, 1], [], []>} : vector<8x64xf32>, vector<64x128xf32>, vector<8x128xf32> -> vector<8x128xf32>
    %346 = vector.broadcast %3 : vector<1x128xf32> to vector<8x128xf32>
    %347 = arith.addf %345, %346 : vector<8x128xf32>
    %348 = vector.extract_strided_slice %347 {offsets = [0, 0], sizes = [8, 32], strides = [1, 1]} : vector<8x128xf32> to vector<8x32xf32>
    %349 = arith.negf %348 : vector<8x32xf32>
    %350 = math.exp %349 : vector<8x32xf32>
    %cst_65 = arith.constant 1.000000e+00 : f32
    %351 = vector.broadcast %cst_65 : f32 to vector<8x32xf32>
    %352 = arith.addf %351, %350 : vector<8x32xf32>
    %353 = arith.divf %351, %352 : vector<8x32xf32>
    %354 = vector.extract_strided_slice %347 {offsets = [0, 32], sizes = [8, 32], strides = [1, 1]} : vector<8x128xf32> to vector<8x32xf32>
    %355 = arith.negf %354 : vector<8x32xf32>
    %356 = math.exp %355 : vector<8x32xf32>
    %cst_66 = arith.constant 1.000000e+00 : f32
    %357 = vector.broadcast %cst_66 : f32 to vector<8x32xf32>
    %358 = arith.addf %357, %356 : vector<8x32xf32>
    %359 = arith.divf %357, %358 : vector<8x32xf32>
    %360 = vector.extract_strided_slice %347 {offsets = [0, 64], sizes = [8, 32], strides = [1, 1]} : vector<8x128xf32> to vector<8x32xf32>
    %361 = math.tanh %360 : vector<8x32xf32>
    %362 = vector.extract_strided_slice %347 {offsets = [0, 96], sizes = [8, 32], strides = [1, 1]} : vector<8x128xf32> to vector<8x32xf32>
    %363 = arith.negf %362 : vector<8x32xf32>
    %364 = math.exp %363 : vector<8x32xf32>
    %cst_67 = arith.constant 1.000000e+00 : f32
    %365 = vector.broadcast %cst_67 : f32 to vector<8x32xf32>
    %366 = arith.addf %365, %364 : vector<8x32xf32>
    %367 = arith.divf %365, %366 : vector<8x32xf32>
    %368 = arith.mulf %359, %310 : vector<8x32xf32>
    %369 = arith.mulf %353, %361 : vector<8x32xf32>
    %370 = arith.addf %368, %369 : vector<8x32xf32>
    %371 = math.tanh %370 : vector<8x32xf32>
    %372 = arith.mulf %367, %371 : vector<8x32xf32>
    %373 = vector.extract_strided_slice %12 {offsets = [6, 0, 0], sizes = [1, 8, 16], strides = [1, 1, 1]} : vector<8x8x16xf32> to vector<1x8x16xf32>
    %374 = vector.shape_cast %373 : vector<1x8x16xf32> to vector<8x16xf32>
    %375 = tpu.concatenate %374, %343 in 1 : vector<8x16xf32>, vector<8x32xf32> -> vector<8x48xf32>
    %cst_68 = arith.constant dense<0.000000e+00> : vector<8x128xf32>
    %376 = tpu.matmul %375, %0, %cst_68 {dimension_numbers = #tpu.dot_dimension_numbers<[1], [0], [0], [1], [0, 0, 1, 1], [], []>} : vector<8x48xf32>, vector<48x128xf32>, vector<8x128xf32> -> vector<8x128xf32>
    %377 = vector.broadcast %2 : vector<1x128xf32> to vector<8x128xf32>
    %378 = arith.addf %376, %377 : vector<8x128xf32>
    %379 = vector.extract_strided_slice %378 {offsets = [0, 0], sizes = [8, 32], strides = [1, 1]} : vector<8x128xf32> to vector<8x32xf32>
    %380 = arith.negf %379 : vector<8x32xf32>
    %381 = math.exp %380 : vector<8x32xf32>
    %cst_69 = arith.constant 1.000000e+00 : f32
    %382 = vector.broadcast %cst_69 : f32 to vector<8x32xf32>
    %383 = arith.addf %382, %381 : vector<8x32xf32>
    %384 = arith.divf %382, %383 : vector<8x32xf32>
    %385 = vector.extract_strided_slice %378 {offsets = [0, 32], sizes = [8, 32], strides = [1, 1]} : vector<8x128xf32> to vector<8x32xf32>
    %386 = arith.negf %385 : vector<8x32xf32>
    %387 = math.exp %386 : vector<8x32xf32>
    %cst_70 = arith.constant 1.000000e+00 : f32
    %388 = vector.broadcast %cst_70 : f32 to vector<8x32xf32>
    %389 = arith.addf %388, %387 : vector<8x32xf32>
    %390 = arith.divf %388, %389 : vector<8x32xf32>
    %391 = vector.extract_strided_slice %378 {offsets = [0, 64], sizes = [8, 32], strides = [1, 1]} : vector<8x128xf32> to vector<8x32xf32>
    %392 = math.tanh %391 : vector<8x32xf32>
    %393 = vector.extract_strided_slice %378 {offsets = [0, 96], sizes = [8, 32], strides = [1, 1]} : vector<8x128xf32> to vector<8x32xf32>
    %394 = arith.negf %393 : vector<8x32xf32>
    %395 = math.exp %394 : vector<8x32xf32>
    %cst_71 = arith.constant 1.000000e+00 : f32
    %396 = vector.broadcast %cst_71 : f32 to vector<8x32xf32>
    %397 = arith.addf %396, %395 : vector<8x32xf32>
    %398 = arith.divf %396, %397 : vector<8x32xf32>
    %399 = arith.mulf %390, %341 : vector<8x32xf32>
    %400 = arith.mulf %384, %392 : vector<8x32xf32>
    %401 = arith.addf %399, %400 : vector<8x32xf32>
    %402 = math.tanh %401 : vector<8x32xf32>
    %403 = arith.mulf %398, %402 : vector<8x32xf32>
    %404 = tpu.concatenate %403, %372 in 1 : vector<8x32xf32>, vector<8x32xf32> -> vector<8x64xf32>
    %cst_72 = arith.constant dense<0.000000e+00> : vector<8x128xf32>
    %405 = tpu.matmul %404, %1, %cst_72 {dimension_numbers = #tpu.dot_dimension_numbers<[1], [0], [0], [1], [0, 0, 1, 1], [], []>} : vector<8x64xf32>, vector<64x128xf32>, vector<8x128xf32> -> vector<8x128xf32>
    %406 = vector.broadcast %3 : vector<1x128xf32> to vector<8x128xf32>
    %407 = arith.addf %405, %406 : vector<8x128xf32>
    %408 = vector.extract_strided_slice %407 {offsets = [0, 0], sizes = [8, 32], strides = [1, 1]} : vector<8x128xf32> to vector<8x32xf32>
    %409 = arith.negf %408 : vector<8x32xf32>
    %410 = math.exp %409 : vector<8x32xf32>
    %cst_73 = arith.constant 1.000000e+00 : f32
    %411 = vector.broadcast %cst_73 : f32 to vector<8x32xf32>
    %412 = arith.addf %411, %410 : vector<8x32xf32>
    %413 = arith.divf %411, %412 : vector<8x32xf32>
    %414 = vector.extract_strided_slice %407 {offsets = [0, 32], sizes = [8, 32], strides = [1, 1]} : vector<8x128xf32> to vector<8x32xf32>
    %415 = arith.negf %414 : vector<8x32xf32>
    %416 = math.exp %415 : vector<8x32xf32>
    %cst_74 = arith.constant 1.000000e+00 : f32
    %417 = vector.broadcast %cst_74 : f32 to vector<8x32xf32>
    %418 = arith.addf %417, %416 : vector<8x32xf32>
    %419 = arith.divf %417, %418 : vector<8x32xf32>
    %420 = vector.extract_strided_slice %407 {offsets = [0, 64], sizes = [8, 32], strides = [1, 1]} : vector<8x128xf32> to vector<8x32xf32>
    %421 = math.tanh %420 : vector<8x32xf32>
    %422 = vector.extract_strided_slice %407 {offsets = [0, 96], sizes = [8, 32], strides = [1, 1]} : vector<8x128xf32> to vector<8x32xf32>
    %423 = arith.negf %422 : vector<8x32xf32>
    %424 = math.exp %423 : vector<8x32xf32>
    %cst_75 = arith.constant 1.000000e+00 : f32
    %425 = vector.broadcast %cst_75 : f32 to vector<8x32xf32>
    %426 = arith.addf %425, %424 : vector<8x32xf32>
    %427 = arith.divf %425, %426 : vector<8x32xf32>
    %428 = arith.mulf %419, %370 : vector<8x32xf32>
    %429 = arith.mulf %413, %421 : vector<8x32xf32>
    %430 = arith.addf %428, %429 : vector<8x32xf32>
    %431 = math.tanh %430 : vector<8x32xf32>
    %432 = arith.mulf %427, %431 : vector<8x32xf32>
    %433 = vector.extract_strided_slice %12 {offsets = [7, 0, 0], sizes = [1, 8, 16], strides = [1, 1, 1]} : vector<8x8x16xf32> to vector<1x8x16xf32>
    %434 = vector.shape_cast %433 : vector<1x8x16xf32> to vector<8x16xf32>
    %435 = tpu.concatenate %434, %403 in 1 : vector<8x16xf32>, vector<8x32xf32> -> vector<8x48xf32>
    %cst_76 = arith.constant dense<0.000000e+00> : vector<8x128xf32>
    %436 = tpu.matmul %435, %0, %cst_76 {dimension_numbers = #tpu.dot_dimension_numbers<[1], [0], [0], [1], [0, 0, 1, 1], [], []>} : vector<8x48xf32>, vector<48x128xf32>, vector<8x128xf32> -> vector<8x128xf32>
    %437 = vector.broadcast %2 : vector<1x128xf32> to vector<8x128xf32>
    %438 = arith.addf %436, %437 : vector<8x128xf32>
    %439 = vector.extract_strided_slice %438 {offsets = [0, 0], sizes = [8, 32], strides = [1, 1]} : vector<8x128xf32> to vector<8x32xf32>
    %440 = arith.negf %439 : vector<8x32xf32>
    %441 = math.exp %440 : vector<8x32xf32>
    %cst_77 = arith.constant 1.000000e+00 : f32
    %442 = vector.broadcast %cst_77 : f32 to vector<8x32xf32>
    %443 = arith.addf %442, %441 : vector<8x32xf32>
    %444 = arith.divf %442, %443 : vector<8x32xf32>
    %445 = vector.extract_strided_slice %438 {offsets = [0, 32], sizes = [8, 32], strides = [1, 1]} : vector<8x128xf32> to vector<8x32xf32>
    %446 = arith.negf %445 : vector<8x32xf32>
    %447 = math.exp %446 : vector<8x32xf32>
    %cst_78 = arith.constant 1.000000e+00 : f32
    %448 = vector.broadcast %cst_78 : f32 to vector<8x32xf32>
    %449 = arith.addf %448, %447 : vector<8x32xf32>
    %450 = arith.divf %448, %449 : vector<8x32xf32>
    %451 = vector.extract_strided_slice %438 {offsets = [0, 64], sizes = [8, 32], strides = [1, 1]} : vector<8x128xf32> to vector<8x32xf32>
    %452 = math.tanh %451 : vector<8x32xf32>
    %453 = vector.extract_strided_slice %438 {offsets = [0, 96], sizes = [8, 32], strides = [1, 1]} : vector<8x128xf32> to vector<8x32xf32>
    %454 = arith.negf %453 : vector<8x32xf32>
    %455 = math.exp %454 : vector<8x32xf32>
    %cst_79 = arith.constant 1.000000e+00 : f32
    %456 = vector.broadcast %cst_79 : f32 to vector<8x32xf32>
    %457 = arith.addf %456, %455 : vector<8x32xf32>
    %458 = arith.divf %456, %457 : vector<8x32xf32>
    %459 = arith.mulf %450, %401 : vector<8x32xf32>
    %460 = arith.mulf %444, %452 : vector<8x32xf32>
    %461 = arith.addf %459, %460 : vector<8x32xf32>
    %462 = math.tanh %461 : vector<8x32xf32>
    %463 = arith.mulf %458, %462 : vector<8x32xf32>
    %464 = tpu.concatenate %463, %432 in 1 : vector<8x32xf32>, vector<8x32xf32> -> vector<8x64xf32>
    %cst_80 = arith.constant dense<0.000000e+00> : vector<8x128xf32>
    %465 = tpu.matmul %464, %1, %cst_80 {dimension_numbers = #tpu.dot_dimension_numbers<[1], [0], [0], [1], [0, 0, 1, 1], [], []>} : vector<8x64xf32>, vector<64x128xf32>, vector<8x128xf32> -> vector<8x128xf32>
    %466 = vector.broadcast %3 : vector<1x128xf32> to vector<8x128xf32>
    %467 = arith.addf %465, %466 : vector<8x128xf32>
    %468 = vector.extract_strided_slice %467 {offsets = [0, 0], sizes = [8, 32], strides = [1, 1]} : vector<8x128xf32> to vector<8x32xf32>
    %469 = arith.negf %468 : vector<8x32xf32>
    %470 = math.exp %469 : vector<8x32xf32>
    %cst_81 = arith.constant 1.000000e+00 : f32
    %471 = vector.broadcast %cst_81 : f32 to vector<8x32xf32>
    %472 = arith.addf %471, %470 : vector<8x32xf32>
    %473 = arith.divf %471, %472 : vector<8x32xf32>
    %474 = vector.extract_strided_slice %467 {offsets = [0, 32], sizes = [8, 32], strides = [1, 1]} : vector<8x128xf32> to vector<8x32xf32>
    %475 = arith.negf %474 : vector<8x32xf32>
    %476 = math.exp %475 : vector<8x32xf32>
    %cst_82 = arith.constant 1.000000e+00 : f32
    %477 = vector.broadcast %cst_82 : f32 to vector<8x32xf32>
    %478 = arith.addf %477, %476 : vector<8x32xf32>
    %479 = arith.divf %477, %478 : vector<8x32xf32>
    %480 = vector.extract_strided_slice %467 {offsets = [0, 64], sizes = [8, 32], strides = [1, 1]} : vector<8x128xf32> to vector<8x32xf32>
    %481 = math.tanh %480 : vector<8x32xf32>
    %482 = vector.extract_strided_slice %467 {offsets = [0, 96], sizes = [8, 32], strides = [1, 1]} : vector<8x128xf32> to vector<8x32xf32>
    %483 = arith.negf %482 : vector<8x32xf32>
    %484 = math.exp %483 : vector<8x32xf32>
    %cst_83 = arith.constant 1.000000e+00 : f32
    %485 = vector.broadcast %cst_83 : f32 to vector<8x32xf32>
    %486 = arith.addf %485, %484 : vector<8x32xf32>
    %487 = arith.divf %485, %486 : vector<8x32xf32>
    %488 = arith.mulf %479, %430 : vector<8x32xf32>
    %489 = arith.mulf %473, %481 : vector<8x32xf32>
    %490 = arith.addf %488, %489 : vector<8x32xf32>
    %491 = math.tanh %490 : vector<8x32xf32>
    %492 = arith.mulf %487, %491 : vector<8x32xf32>
    %493 = tpu.concatenate %72, %132, %192, %252, %312, %372, %432, %492 in 0 : vector<8x32xf32>, vector<8x32xf32>, vector<8x32xf32>, vector<8x32xf32>, vector<8x32xf32>, vector<8x32xf32>, vector<8x32xf32>, vector<8x32xf32> -> vector<64x32xf32>
    %c0_84 = arith.constant 0 : index
    %c0_85 = arith.constant 0 : index
    %494 = vector.load %arg6[%c0_84, %c0_85] : memref<32x128xf32, #tpu.memory_space<vmem>>, vector<32x128xf32>
    %cst_86 = arith.constant dense<0.000000e+00> : vector<64x128xf32>
    %495 = tpu.matmul %493, %494, %cst_86 {dimension_numbers = #tpu.dot_dimension_numbers<[1], [0], [0], [1], [0, 0, 1, 1], [], []>} : vector<64x32xf32>, vector<32x128xf32>, vector<64x128xf32> -> vector<64x128xf32>
    %c0_87 = arith.constant 0 : index
    %c0_88 = arith.constant 0 : index
    %496 = vector.load %arg7[%c0_87, %c0_88] : memref<1x128xf32, #tpu.memory_space<vmem>>, vector<1x128xf32>
    %497 = vector.broadcast %496 : vector<1x128xf32> to vector<64x128xf32>
    %498 = arith.addf %495, %497 : vector<64x128xf32>
    %499 = vector.shape_cast %498 : vector<64x128xf32> to vector<8x8x128xf32>
    %c0_89 = arith.constant 0 : index
    %c0_90 = arith.constant 0 : index
    %c0_91 = arith.constant 0 : index
    %500 = vector.load %arg10[%c0_89, %c0_90, %c0_91] : memref<8x8x128xf32, #tpu.memory_space<vmem>>, vector<8x8x128xf32>
    tpu.vector_store %arg10[%c0_89, %c0_90, %c0_91], %499 {strides = array<i32>} : memref<8x8x128xf32, #tpu.memory_space<vmem>>, vector<8x8x128xf32>,
    return
  }
  func.func @transform_0(%arg0: i32) -> (i32, i32, i32) {
    %c0_i32 = arith.constant 0 : i32
    %c0_i32_0 = arith.constant 0 : i32
    %c0_i32_1 = arith.constant 0 : i32
    %c0_i32_2 = arith.constant 0 : i32
    return %c0_i32, %c0_i32_0, %c0_i32_1 : i32, i32, i32
  }
  func.func @transform_1(%arg0: i32) -> (i32, i32) {
    %c0_i32 = arith.constant 0 : i32
    %c0_i32_0 = arith.constant 0 : i32
    %c0_i32_1 = arith.constant 0 : i32
    return %c0_i32, %c0_i32_0 : i32, i32
  }
  func.func @transform_2(%arg0: i32) -> (i32, i32) {
    %c0_i32 = arith.constant 0 : i32
    %c0_i32_0 = arith.constant 0 : i32
    %c0_i32_1 = arith.constant 0 : i32
    return %c0_i32, %c0_i32_0 : i32, i32
  }
  func.func @transform_3(%arg0: i32) -> (i32, i32) {
    %c0_i32 = arith.constant 0 : i32
    %c0_i32_0 = arith.constant 0 : i32
    %c0_i32_1 = arith.constant 0 : i32
    return %c0_i32, %c0_i32_0 : i32, i32
  }
  func.func @transform_4(%arg0: i32) -> (i32, i32) {
    %c0_i32 = arith.constant 0 : i32
    %c0_i32_0 = arith.constant 0 : i32
    %c0_i32_1 = arith.constant 0 : i32
    return %c0_i32, %c0_i32_0 : i32, i32
  }
  func.func @transform_5(%arg0: i32) -> (i32, i32) {
    %c0_i32 = arith.constant 0 : i32
    %c0_i32_0 = arith.constant 0 : i32
    %c0_i32_1 = arith.constant 0 : i32
    return %c0_i32, %c0_i32_0 : i32, i32
  }
  func.func @transform_6(%arg0: i32) -> (i32, i32) {
    %c0_i32 = arith.constant 0 : i32
    %c0_i32_0 = arith.constant 0 : i32
    %c0_i32_1 = arith.constant 0 : i32
    return %c0_i32, %c0_i32_0 : i32, i32
  }
  func.func @transform_7(%arg0: i32) -> (i32, i32, i32) {
    %c0_i32 = arith.constant 0 : i32
    %c0_i32_0 = arith.constant 0 : i32
    %c0_i32_1 = arith.constant 0 : i32
    %c0_i32_2 = arith.constant 0 : i32
    return %c0_i32, %c0_i32_0, %c0_i32_1 : i32, i32, i32
  }
  func.func @transform_8(%arg0: i32) -> (i32, i32, i32) {
    %c0_i32 = arith.constant 0 : i32
    %c0_i32_0 = arith.constant 0 : i32
    %c0_i32_1 = arith.constant 0 : i32
    %c0_i32_2 = arith.constant 0 : i32
    return %c0_i32, %c0_i32_0, %c0_i32_1 : i32, i32, i32
  }
  func.func @transform_9(%arg0: i32) -> (i32, i32, i32) {
    %c0_i32 = arith.constant 0 : i32
    %c0_i32_0 = arith.constant 0 : i32
    %c0_i32_1 = arith.constant 0 : i32
    %c0_i32_2 = arith.constant 0 : i32
    return %c0_i32, %c0_i32_0, %c0_i32_1 : i32, i32, i32
  }
}

</mosaic_0001>

<bundles_post_ra>
// kernel: tpu_custom_call.1
= control target key start
LH: loop header
LB: loop body
LE: loop exit
PB: predicated region body
PF: predicated region fallthrough
CT: control target
= control target key end

     0   :  { %14 = vsyncpa [#allocation3], 0  ;;  %s3396_s0 = inlined_call_operand.hbm [shape: f32[8,8,16], index: 0, kind: input, shape index: {}]   ;;  %s3397_s1 = inlined_call_operand.hbm [shape: f32[48,128], index: 1, kind: input, shape index: {}]   ;;  %s3398_s2 = inlined_call_operand.vmem [shape: f32[1,128], index: 2, kind: input, shape index: {}]   ;;  %s3399_s3 = inlined_call_operand.hbm [shape: f32[64,128], index: 3, kind: input, shape index: {}]   ;;  %s3400_s4 = inlined_call_operand.vmem [shape: f32[1,128], index: 4, kind: input, shape index: {}]   ;;  %s3401_s5 = inlined_call_operand.hbm [shape: f32[32,128], index: 5, kind: input, shape index: {}]   ;;  %s3402_s6 = inlined_call_operand.vmem [shape: f32[1,128], index: 6, kind: input, shape index: {}]   ;;  %s3403_s7 = inlined_call_operand.hbm [shape: f32[2,8,32], index: 7, kind: input, shape index: {}]   ;;  %s3404_s8 = inlined_call_operand.hbm [shape: f32[2,8,32], index: 8, kind: input, shape index: {}]   ;;  %s3405_s9 = inlined_call_operand.hbm [shape: f32[8,8,128], index: 9, kind: output, shape index: {}]  }
   0x1   :  { %15 = vsyncpa [#allocation6], 0 }
   0x2   :  { %16 = vsyncpa [#allocation9], 0 }
   0x3   :  { %17 = vsyncpa [#allocation12], 0 }
   0x4   :  { %18 = vsyncpa [#allocation4], 0  ;;  %s2787_s30 = smov [#allocation5]   ;;  %s2788_s11 = smov [#allocation8]  }
   0x5   :  { %s36_s10 = sshll.u32 %s2787_s30, 4  ;;  %s64_s12 = sshll.u32 %s2788_s11, 4  ;;  %s37_s10 = int_to_ptr.vmem [resolvable:$true] %s36_s10  ;;  %s65_s12 = int_to_ptr.vmem [resolvable:$true] %s64_s12 }
   0x6   :  { %s2645_s13 = scalar_lea.vmem %s37_s10, 768  ;;  %p2650_p1 = scmp.lt.s32.totalorder %s37_s10, %s37_s10 }
   0x7   :  { %p2646_p0 = scmp.ne.s32.totalorder %s37_s10, %s2645_s13  ;;  %p2651_p2 = scmp.lt.s32.totalorder %s2645_s13, %s2645_s13 }
   0x9   :  { %p2652_p3 = por %p2651_p2, %p2650_p1 }
   0xb   :  { %p2653_p4 = pnand %p2652_p3, %p2646_p0 }
   0xd   :  { %2656 = shalt.err (!%p2653_p4)
}
   0xe   :  { %s2789_s14 = smov 128   ;;  %s2790_s15 = smov 8  }
   0xf   :  { %42 = dma.hbm_to_vmem [thread:$0]  %s3397_s1, 768, %s37_s10, [#allocation6], %s2789_s14, %s2789_s14, %s2790_s15  }
  0x10   :  { %s2665_s18 = scalar_lea.vmem %s65_s12, 512  ;;  %p2670_p6 = scmp.lt.s32.totalorder %s65_s12, %s65_s12 }
  0x11   :  { %p2666_p5 = scmp.ne.s32.totalorder %s65_s12, %s2665_s18  ;;  %p2671_p7 = scmp.lt.s32.totalorder %s2665_s18, %s2665_s18 }
  0x13   :  { %p2672_p8 = por %p2671_p7, %p2670_p6 }
  0x15   :  { %p2673_p9 = pnand %p2672_p8, %p2666_p5 }
  0x17   :  { %2676 = shalt.err (!%p2673_p9)
}
  0x18   :  { %70 = dma.hbm_to_vmem [thread:$0]  %s3401_s5, 512, %s65_s12, [#allocation9], %s2789_s14, %s2789_s14, %s2790_s15  }
  0x19   :  { %s2791_s21 = smov [#allocation2]   ;;  %s2792_s23 = smov [#allocation7]  }
  0x1a   :  { %s24_s22 = sshll.u32 %s2791_s21, 4  ;;  %s50_s24 = sshll.u32 %s2792_s23, 4  ;;  %s25_s22 = int_to_ptr.vmem [resolvable:$true] %s24_s22  ;;  %s51_s24 = int_to_ptr.vmem [resolvable:$true] %s50_s24 }
  0x1b   :  { %s2685_s1 = scalar_lea.vmem %s25_s22, 1024  ;;  %p2690_p11 = scmp.lt.s32.totalorder %s25_s22, %s25_s22 }
  0x1c   :  { %p2686_p10 = scmp.ne.s32.totalorder %s25_s22, %s2685_s1  ;;  %p2691_p12 = scmp.lt.s32.totalorder %s2685_s1, %s2685_s1 }
  0x1e   :  { %p2692_p13 = por %p2691_p12, %p2690_p11 }
  0x20   :  { %p2693_p0 = pnand %p2692_p13, %p2686_p10 }
  0x22   :  { %2696 = shalt.err (!%p2693_p0)
}
  0x23   :  { %30 = dma.hbm_to_vmem [thread:$0]  %s3396_s0, 1024, %s25_s22, [#allocation3], %s2789_s14, %s2789_s14, %s2790_s15  }
  0x24   :  { %s2705_s5 = scalar_lea.vmem %s51_s24, 1024  ;;  %p2710_p2 = scmp.lt.s32.totalorder %s51_s24, %s51_s24 }
  0x25   :  { %p2706_p1 = scmp.ne.s32.totalorder %s51_s24, %s2705_s5  ;;  %p2711_p3 = scmp.lt.s32.totalorder %s2705_s5, %s2705_s5 }
  0x27   :  { %p2712_p4 = por %p2711_p3, %p2710_p2 }
  0x29   :  { %p2713_p5 = pnand %p2712_p4, %p2706_p1 }
  0x2b   :  { %2716 = shalt.err (!%p2713_p5)
}
  0x2c   :  { %56 = dma.hbm_to_vmem [thread:$0]  %s3399_s3, 1024, %s51_s24, [#allocation6], %s2789_s14, %s2789_s14, %s2790_s15  }
  0x2d   :  { %s2793_s29 = smov [#allocation10]   ;;  %s2794_s10 = smov [#allocation11]  }
  0x2e   :  { %s78_s30 = sshll.u32 %s2793_s29, 4  ;;  %s90_s11 = sshll.u32 %s2794_s10, 4  ;;  %s79_s30 = int_to_ptr.vmem [resolvable:$true] %s78_s30  ;;  %s91_s11 = int_to_ptr.vmem [resolvable:$true] %s90_s11 }
  0x2f   :  { %s2725_s0 = scalar_lea.vmem %s79_s30, 256  ;;  %p2730_p7 = scmp.lt.s32.totalorder %s79_s30, %s79_s30 }
  0x30   :  { %p2726_p6 = scmp.ne.s32.totalorder %s79_s30, %s2725_s0  ;;  %p2731_p8 = scmp.lt.s32.totalorder %s2725_s0, %s2725_s0 }
  0x32   :  { %p2732_p9 = por %p2731_p8, %p2730_p7 }
  0x34   :  { %p2733_p10 = pnand %p2732_p9, %p2726_p6 }
  0x36   :  { %2736 = shalt.err (!%p2733_p10)
}
  0x37   :  { %84 = dma.hbm_to_vmem [thread:$0]  %s3403_s7, 256, %s79_s30, [#allocation9], %s2789_s14, %s2789_s14, %s2790_s15  }
  0x38   :  { %s2745_s3 = scalar_lea.vmem %s91_s11, 256  ;;  %p2750_p12 = scmp.lt.s32.totalorder %s91_s11, %s91_s11 }
  0x39   :  { %p2746_p11 = scmp.ne.s32.totalorder %s91_s11, %s2745_s3  ;;  %p2751_p13 = scmp.lt.s32.totalorder %s2745_s3, %s2745_s3 }
  0x3b   :  { %p2752_p0 = por %p2751_p13, %p2750_p12 }
  0x3d   :  { %p2753_p1 = pnand %p2752_p0, %p2746_p11 }
  0x3f   :  { %2756 = shalt.err (!%p2753_p1)
}
  0x40   :  { %96 = dma.hbm_to_vmem [thread:$0]  %s3404_s8, 256, %s91_s11, [#allocation12], %s2789_s14, %s2789_s14, %s2790_s15  }
  0x41   :  { %2777 = dma.done.wait [#allocation3], 1024  }
  0x42   :  { %2778 = vsyncadd [#allocation3], 4294966272 }
  0x43   :  { %2779 = dma.done.wait [#allocation6], 1792  }
  0x44   :  { %2780 = vsyncadd [#allocation6], 4294965504 }
  0x45   :  { %2781 = dma.done.wait [#allocation9], 768  }
  0x46   :  { %2782 = vsyncadd [#allocation9], 4294966528 }
  0x47   :  { %2783 = dma.done.wait [#allocation12], 256  }
  0x48   :  { %2784 = vsyncadd [#allocation12], 4294967040  ;;  %v2795_v0 = vmov 0.0   ;;  %vm2796_vm0 = vmmov 0   ;;  %v131_v1 = vld [vmem:[#allocation10] sm:$0xff]  ;;  %v2894_v2 = vld [vmem:[#allocation5 + $0x28] sm:$0xff] }
  0x49   :  { %2186 = vmatprep.subr.mxu0 %v2795_v0  ;;  %2198 = vmatprep.mubr.msk.f32.mxu0 %vm2796_vm0, %v2795_v0  ;;  %v2896_v3 = vld [vmem:[#allocation5 + $0x20] sm:$0xff]  ;;  %s2797_s7 = smov 16   ;;  %v2900_v4 = vld [vmem:[#allocation5 + $0x18] sm:$0xff]  ;;  %s2798_s8 = smov 32   ;;  %v2905_v6 = vld [vmem:[#allocation5 + $0x10] sm:$0xff]  ;;  %vm149_vm1 = vcmask 130048  }
  0x4a   :  { %2201 = vmatprep.subr.mxu1 %v2795_v0  ;;  %2217 = vmatprep.mubr.msk.f32.mxu1 %vm2796_vm0, %v2795_v0  ;;  %v134_v5 = vld [vmem:[#allocation11] sm:$0xff]  ;;  %v2909_v7 = vld [vmem:[#allocation5 + $0x8] sm:$0xff]  ;;  %vm157_vm2 = vcmask 392192   ;;  %s2799_s20 = smov 64   ;;  %v2952_v29 = vld [vmem:[#allocation7 + $0x28] sm:$0xff]  ;;  %s2800_s21 = smov 48  }
  0x4b   :  { %146 = vrot.lane.b32.xlu0 %v131_v1, %s2797_s7  ;;  %2187 = vmatpush3.msra.mxu0 %v2894_v2  ;;  %v2913_v8 = vld [vmem:[#allocation5] sm:$0xff]  ;;  %v2946_v27 = vld [vmem:[#allocation7 + $0x38] sm:$0xff]  ;;  %v2956_v30 = vld [vmem:[#allocation7 + $0x20] sm:$0xff]  ;;  %vm267_vm3 = vcmask 261120   ;;  %vm275_vm4 = vcmask 523264  }
  0x4c   :  { %2188 = vmatprep.subr.mxu0 %v2795_v0  ;;  %239 = vrot.lane.b32.xlu1 %v134_v5, %s2798_s8  ;;  %v137_v9 = vld [vmem:[#allocation2] sm:$0xff]  ;;  %v2960_v32 = vld [vmem:[#allocation7 + $0x18] sm:$0xff]  ;;  %v133_v33 = vld [vmem:[#allocation10 + $0x8] sm:$0xff] }
  0x4d   :  { %2189 = vmatpush3.msra.mxu0 %v2896_v3  ;;  %v2938_v12 = vld [vmem:[%s3398_s2] ss:$0 sm:$0xff]  ;;  %2202 = vmatpush3.msra.mxu1 %v2946_v27  ;;  %v2969_v35 = vld [vmem:[#allocation7 + $0x8] sm:$0xff]  ;;  %v2976_v36 = vld [vmem:[#allocation7] sm:$0xff] }
  0x4e   :  { %2190 = vmatprep.subr.mxu0 %v2795_v0  ;;  %v2948_v28 = vld [vmem:[#allocation7 + $0x30] sm:$0xff]  ;;  %2203 = vmatprep.subr.mxu1 %v2795_v0  ;;  %v138_v42 = vld [vmem:[#allocation2 + $0x8] sm:$0xff] }
  0x4f   :  { %2191 = vmatpush3.msra.mxu0 %v2900_v4  ;;  %2204 = vmatpush3.msra.mxu1 %v2948_v28  ;;  %v2965_v34 = vld [vmem:[#allocation7 + $0x10] sm:$0xff]  ;;  %v136_v53 = vld [vmem:[#allocation11 + $0x8] sm:$0xff] }
  0x50   :  { %2192 = vmatprep.subr.mxu0 %v2795_v0  ;;  %2205 = vmatprep.subr.mxu1 %v2795_v0  ;;  %v3021_v45 = vld [vmem:[%s3400_s4] ss:$0 sm:$0xff] }
  0x51   :  { %2193 = vmatpush3.msra.mxu0 %v2905_v6  ;;  %2206 = vmatpush3.msra.mxu1 %v2952_v29 }
  0x52   :  { %2194 = vmatprep.subr.mxu0 %v2795_v0  ;;  %2207 = vmatprep.subr.mxu1 %v2795_v0 }
  0x53   :  { %2195 = vmatpush3.msra.mxu0 %v2909_v7  ;;  %2208 = vmatpush3.msra.mxu1 %v2956_v30 }
  0x54   :  { %2196 = vmatprep.subr.mxu0 %v2795_v0  ;;  %2209 = vmatprep.subr.mxu1 %v2795_v0 }
  0x55   :  { %2197 = vmatpush3.msra.mxu0 %v2913_v8  ;;  %2210 = vmatpush3.msra.mxu1 %v2960_v32 }
  0x56   :  { %2220 = vmatprep.subr.mxu0 %v2795_v0  ;;  %2211 = vmatprep.subr.mxu1 %v2795_v0 }
  0x57   :  { %2212 = vmatpush3.msra.mxu1 %v2965_v34 }
  0x58   :  { %2213 = vmatprep.subr.mxu1 %v2795_v0 }
  0x59   :  { %2214 = vmatpush3.msra.mxu1 %v2969_v35 }
  0x5a   :  { %2215 = vmatprep.subr.mxu1 %v2795_v0 }
  0x5b   :  { %2216 = vmatpush3.msra.mxu1 %v2976_v36 }
  0x5c   :  { %2235 = vmatprep.subr.mxu1 %v2795_v0 }
  0xbd   :  { %v147_v10 = vpop.permute.xlu0 %146 }
  0xbe   :  { %v150_v11 = vsel %vm149_vm1, %v137_v9, %v147_v10  ;;  %v240_v23 = vpop.permute.xlu1 %239 }
  0xbf   :  { %2199 = vmatmul.mubr.msk.f32.vlgmr.msra.gmra.mxu0 %vm157_vm2, %v150_v11 }
  0xc0   :  { %2221 = vmatpush3.msra.mxu0 %v2894_v2  ;;  %2232 = vmatprep.mubr.msk.f32.mxu0 %vm2796_vm0, %v2795_v0 }
  0xc1   :  { %2222 = vmatprep.subr.mxu0 %v2795_v0 }
  0xc2   :  { %2223 = vmatpush3.msra.mxu0 %v2896_v3 }
  0xc3   :  { %2224 = vmatprep.subr.mxu0 %v2795_v0 }
  0xc4   :  { %2225 = vmatpush3.msra.mxu0 %v2900_v4 }
  0xc5   :  { %2226 = vmatprep.subr.mxu0 %v2795_v0 }
  0xc6   :  { %2227 = vmatpush3.msra.mxu0 %v2905_v6 }
  0xc7   :  { %2228 = vmatprep.subr.mxu0 %v2795_v0 }
  0xc8   :  { %2229 = vmatpush3.msra.mxu0 %v2909_v7 }
  0xc9   :  { %2230 = vmatprep.subr.mxu0 %v2795_v0 }
  0xca   :  { %2231 = vmatpush3.msra.mxu0 %v2913_v8 }
  0xcb   :  { %2254 = vmatprep.subr.mxu0 %v2795_v0 }
 0x17f   :  { %v227_v13 = vpop.f32.mrf.mxu0 }
 0x180   :  { %v228_v14 = vadd.f32 %v2938_v12, %v227_v13 }
 0x181   :  { %v2200_v15 = vpop.f32.mrf.mxu0 }
 0x182   :  { %2493 = vtanh.f32 %v228_v14  ;;  %v2005_v17 = vmul.f32 -1.442695, %v228_v14 }
 0x184   :  { %2495 = vpow2.f32 %v2005_v17 }
 0x18f   :  { %v2494_v16 = vpop.eup %2493 }
 0x190   :  { %244 = vrot.lane.b32.xlu0 %v2494_v16, %s2799_s20 }
 0x191   :  { %v2496_v18 = vpop.eup %2495 }
 0x192   :  { %v234_v19 = vadd.f32 1.0, %v2496_v18 }
 0x194   :  { %2497 = vrcp.f32 %v234_v19 }
 0x1a1   :  { %v2498_v20 = vpop.eup %2497 }
 0x1a2   :  { %v242_v24 = vmul.f32 %v2498_v20, %v240_v23 }
 0x202   :  { %v245_v21 = vpop.permute.xlu0 %244 }
 0x203   :  { %v247_v22 = vmul.f32 %v2498_v20, %v245_v21 }
 0x205   :  { %249 = vrot.lane.b32.xlu1 %v247_v22, %s2798_s8 }
 0x277   :  { %v250_v25 = vpop.permute.xlu1 %249 }
 0x278   :  { %v2943_v26 = vadd.f32 %v250_v25, %v242_v24 }
 0x27a   :  { %2499 = vtanh.f32 %v2943_v26 }
 0x287   :  { %v2500_v31 = vpop.eup %2499 }
 0x288   :  { %255 = vrot.lane.b32.xlu0 %v2500_v31, %s2799_s20  ;;  %v139_v31 = vld [vmem:[#allocation2 + $0x10] sm:$0xff] }
 0x28c   :  { %264 = vrot.lane.b32.xlu0 %v133_v33, %s2798_s8 }
 0x2fa   :  { %v256_v37 = vpop.permute.xlu0 %255 }
 0x2fb   :  { %v258_v38 = vmul.f32 %v2498_v20, %v256_v37 }
 0x2fd   :  { %260 = vrot.lane.b32.xlu1 %v258_v38, %s2798_s8 }
 0x2fe   :  { %v265_v39 = vpop.permute.xlu0 %264 }
 0x301   :  { %377 = vrot.lane.b32.xlu1 %v258_v38, %s2800_s21 }
 0x36f   :  { %v261_v40 = vpop.permute.xlu1 %260 }
 0x370   :  { %v268_v41 = vsel %vm267_vm3, %v261_v40, %v265_v39 }
 0x371   :  { %2218 = vmatmul.mubr.msk.f32.vlgmr.msra.gmra.mxu1 %vm275_vm4, %v268_v41 }
 0x372   :  { %2236 = vmatpush3.msra.mxu1 %v2946_v27  ;;  %2251 = vmatprep.mubr.msk.f32.mxu1 %vm2796_vm0, %v2795_v0 }
 0x373   :  { %v378_v43 = vpop.permute.xlu1 %377  ;;  %2237 = vmatprep.subr.mxu1 %v2795_v0 }
 0x374   :  { %v380_v44 = vsel %vm149_vm1, %v138_v42, %v378_v43  ;;  %2238 = vmatpush3.msra.mxu1 %v2948_v28 }
 0x375   :  { %2233 = vmatmul.mubr.msk.f32.vlgmr.msra.gmra.mxu0 %vm157_vm2, %v380_v44  ;;  %2239 = vmatprep.subr.mxu1 %v2795_v0 }
 0x376   :  { %2240 = vmatpush3.msra.mxu1 %v2952_v29  ;;  %2255 = vmatpush3.msra.mxu0 %v2894_v2 }
 0x377   :  { %2241 = vmatprep.subr.mxu1 %v2795_v0  ;;  %2256 = vmatprep.subr.mxu0 %v2795_v0 }
 0x378   :  { %2242 = vmatpush3.msra.mxu1 %v2956_v30  ;;  %2257 = vmatpush3.msra.mxu0 %v2896_v3 }
 0x379   :  { %2243 = vmatprep.subr.mxu1 %v2795_v0  ;;  %2258 = vmatprep.subr.mxu0 %v2795_v0 }
 0x37a   :  { %2244 = vmatpush3.msra.mxu1 %v2960_v32  ;;  %2259 = vmatpush3.msra.mxu0 %v2900_v4 }
 0x37b   :  { %2245 = vmatprep.subr.mxu1 %v2795_v0  ;;  %2260 = vmatprep.subr.mxu0 %v2795_v0 }
 0x37c   :  { %2246 = vmatpush3.msra.mxu1 %v2965_v34  ;;  %2261 = vmatpush3.msra.mxu0 %v2905_v6 }
 0x37d   :  { %2247 = vmatprep.subr.mxu1 %v2795_v0  ;;  %2262 = vmatprep.subr.mxu0 %v2795_v0 }
 0x37e   :  { %2248 = vmatpush3.msra.mxu1 %v2969_v35  ;;  %2263 = vmatpush3.msra.mxu0 %v2909_v7 }
 0x37f   :  { %2249 = vmatprep.subr.mxu1 %v2795_v0  ;;  %2264 = vmatprep.subr.mxu0 %v2795_v0 }
 0x380   :  { %2250 = vmatpush3.msra.mxu1 %v2976_v36  ;;  %2265 = vmatpush3.msra.mxu0 %v2913_v8 }
 0x381   :  { %2266 = vmatprep.mubr.msk.f32.mxu0 %vm2796_vm0, %v2795_v0  ;;  %2269 = vmatprep.subr.mxu1 %v2795_v0 }
 0x382   :  { %2288 = vmatprep.subr.mxu0 %v2795_v0 }
 0x431   :  { %v345_v46 = vpop.f32.mrf.mxu1 }
 0x432   :  { %v346_v47 = vadd.f32 %v3021_v45, %v345_v46 }
 0x433   :  { %v2219_v48 = vpop.f32.mrf.mxu1 }
 0x434   :  { %2501 = vtanh.f32 %v346_v47  ;;  %v2008_v55 = vmul.f32 -1.442695, %v346_v47 }
 0x435   :  { %v450_v49 = vpop.f32.mrf.mxu0 }
 0x436   :  { %v451_v50 = vadd.f32 %v2938_v12, %v450_v49 }
 0x437   :  { %v2234_v51 = vpop.f32.mrf.mxu0 }
 0x438   :  { %2503 = vtanh.f32 %v451_v50  ;;  %v2010_v56 = vmul.f32 -1.442695, %v451_v50 }
 0x439   :  { %2505 = vpow2.f32 %v2008_v55 }
 0x43a   :  { %2507 = vpow2.f32 %v2010_v56 }
 0x441   :  { %v2502_v52 = vpop.eup %2501 }
 0x442   :  { %362 = vrot.lane.b32.xlu0 %v2502_v52, %s2799_s20 }
 0x445   :  { %v2504_v54 = vpop.eup %2503 }
 0x446   :  { %357 = vrot.lane.b32.xlu0 %v136_v53, %s2798_s8  ;;  %463 = vrot.lane.b32.xlu1 %v2504_v54, %s2799_s20  ;;  %v2506_v57 = vpop.eup %2505 }
 0x447   :  { %v352_v58 = vadd.f32 1.0, %v2506_v57  ;;  %v2508_v59 = vpop.eup %2507 }
 0x448   :  { %v457_v60 = vadd.f32 1.0, %v2508_v59 }
 0x449   :  { %2509 = vrcp.f32 %v352_v58 }
 0x44a   :  { %2511 = vrcp.f32 %v457_v60 }
 0x456   :  { %v2510_v61 = vpop.eup %2509 }
 0x457   :  { %v2512_v1 = vpop.eup %2511 }
 0x458   :  { %v461_v15 = vmul.f32 %v2512_v1, %v2943_v26 }
 0x4b4   :  { %v363_v62 = vpop.permute.xlu0 %362 }
 0x4b5   :  { %v365_v63 = vmul.f32 %v2510_v61, %v363_v62 }
 0x4b7   :  { %367 = vrot.lane.b32.xlu1 %v365_v63, %s2798_s8 }
 0x4b8   :  { %v464_v5 = vpop.permute.xlu1 %463  ;;  %v358_v10 = vpop.permute.xlu0 %357 }
 0x4b9   :  { %v466_v9 = vmul.f32 %v2512_v1, %v464_v5  ;;  %v360_v11 = vmul.f32 %v2510_v61, %v358_v10 }
 0x4bb   :  { %468 = vrot.lane.b32.xlu0 %v466_v9, %s2798_s8 }
 0x529   :  { %v368_v13 = vpop.permute.xlu1 %367 }
 0x52a   :  { %v3030_v14 = vadd.f32 %v368_v13, %v360_v11 }
 0x52c   :  { %2513 = vtanh.f32 %v3030_v14 }
 0x52d   :  { %v469_v16 = vpop.permute.xlu0 %468 }
 0x52e   :  { %v3034_v17 = vadd.f32 %v469_v16, %v461_v15 }
 0x530   :  { %2515 = vtanh.f32 %v3034_v17 }
 0x539   :  { %v2514_v18 = vpop.eup %2513 }
 0x53a   :  { %373 = vrot.lane.b32.xlu1 %v2514_v18, %s2799_s20  ;;  %v140_v18 = vld [vmem:[#allocation2 + $0x18] sm:$0xff] }
 0x53d   :  { %v2516_v19 = vpop.eup %2515 }
 0x53e   :  { %474 = vrot.lane.b32.xlu0 %v2516_v19, %s2799_s20 }
 0x5ac   :  { %v374_v20 = vpop.permute.xlu1 %373 }
 0x5ad   :  { %v3039_v21 = vmul.f32 %v2510_v61, %v374_v20 }
 0x5af   :  { %483 = vrot.lane.b32.xlu0 %v3039_v21, %s2799_s20 }
 0x5b0   :  { %v475_v22 = vpop.permute.xlu0 %474 }
 0x5b1   :  { %v477_v23 = vmul.f32 %v2512_v1, %v475_v22 }
 0x5b3   :  { %479 = vrot.lane.b32.xlu1 %v477_v23, %s2798_s8 }
 0x5b7   :  { %584 = vrot.lane.b32.xlu1 %v477_v23, %s2800_s21 }
 0x621   :  { %v484_v24 = vpop.permute.xlu0 %483 }
 0x625   :  { %v480_v25 = vpop.permute.xlu1 %479 }
 0x626   :  { %v486_v26 = vsel %vm267_vm3, %v480_v25, %v484_v24 }
 0x627   :  { %2252 = vmatmul.mubr.msk.f32.vlgmr.msra.gmra.mxu1 %vm275_vm4, %v486_v26 }
 0x628   :  { %2270 = vmatpush3.msra.mxu1 %v2946_v27  ;;  %2285 = vmatprep.mubr.msk.f32.mxu1 %vm2796_vm0, %v2795_v0 }
 0x629   :  { %v585_v33 = vpop.permute.xlu1 %584  ;;  %2271 = vmatprep.subr.mxu1 %v2795_v0 }
 0x62a   :  { %v587_v37 = vsel %vm149_vm1, %v139_v31, %v585_v33  ;;  %2272 = vmatpush3.msra.mxu1 %v2948_v28 }
 0x62b   :  { %2267 = vmatmul.mubr.msk.f32.vlgmr.msra.gmra.mxu0 %vm157_vm2, %v587_v37  ;;  %2273 = vmatprep.subr.mxu1 %v2795_v0 }
 0x62c   :  { %2274 = vmatpush3.msra.mxu1 %v2952_v29  ;;  %2289 = vmatpush3.msra.mxu0 %v2894_v2 }
 0x62d   :  { %2275 = vmatprep.subr.mxu1 %v2795_v0  ;;  %2290 = vmatprep.subr.mxu0 %v2795_v0 }
 0x62e   :  { %2276 = vmatpush3.msra.mxu1 %v2956_v30  ;;  %2291 = vmatpush3.msra.mxu0 %v2896_v3 }
 0x62f   :  { %2277 = vmatprep.subr.mxu1 %v2795_v0  ;;  %2292 = vmatprep.subr.mxu0 %v2795_v0 }
 0x630   :  { %2278 = vmatpush3.msra.mxu1 %v2960_v32  ;;  %2293 = vmatpush3.msra.mxu0 %v2900_v4 }
 0x631   :  { %2279 = vmatprep.subr.mxu1 %v2795_v0  ;;  %2294 = vmatprep.subr.mxu0 %v2795_v0 }
 0x632   :  { %2280 = vmatpush3.msra.mxu1 %v2965_v34  ;;  %2295 = vmatpush3.msra.mxu0 %v2905_v6 }
 0x633   :  { %2281 = vmatprep.subr.mxu1 %v2795_v0  ;;  %2296 = vmatprep.subr.mxu0 %v2795_v0 }
 0x634   :  { %2282 = vmatpush3.msra.mxu1 %v2969_v35  ;;  %2297 = vmatpush3.msra.mxu0 %v2909_v7 }
 0x635   :  { %2283 = vmatprep.subr.mxu1 %v2795_v0  ;;  %2298 = vmatprep.subr.mxu0 %v2795_v0 }
 0x636   :  { %2284 = vmatpush3.msra.mxu1 %v2976_v36  ;;  %2299 = vmatpush3.msra.mxu0 %v2913_v8 }
 0x637   :  { %2300 = vmatprep.mubr.msk.f32.mxu0 %vm2796_vm0, %v2795_v0  ;;  %2303 = vmatprep.subr.mxu0 %v2795_v0 }
 0x638   :  { %2322 = vmatprep.subr.mxu1 %v2795_v0 }
 0x6e7   :  { %v556_v38 = vpop.f32.mrf.mxu1 }
 0x6e8   :  { %v557_v39 = vadd.f32 %v3021_v45, %v556_v38 }
 0x6e9   :  { %v2253_v40 = vpop.f32.mrf.mxu1 }
 0x6ea   :  { %2517 = vtanh.f32 %v557_v39  ;;  %v2012_v47 = vmul.f32 -1.442695, %v557_v39 }
 0x6eb   :  { %v657_v41 = vpop.f32.mrf.mxu0 }
 0x6ec   :  { %v658_v42 = vadd.f32 %v2938_v12, %v657_v41 }
 0x6ed   :  { %v2268_v43 = vpop.f32.mrf.mxu0 }
 0x6ee   :  { %2519 = vtanh.f32 %v658_v42  ;;  %v2014_v48 = vmul.f32 -1.442695, %v658_v42 }
 0x6ef   :  { %2521 = vpow2.f32 %v2012_v47 }
 0x6f0   :  { %2523 = vpow2.f32 %v2014_v48 }
 0x6f7   :  { %v2518_v44 = vpop.eup %2517 }
 0x6f8   :  { %569 = vrot.lane.b32.xlu0 %v2518_v44, %s2799_s20 }
 0x6fb   :  { %v2520_v46 = vpop.eup %2519 }
 0x6fc   :  { %670 = vrot.lane.b32.xlu1 %v2520_v46, %s2799_s20  ;;  %v2522_v49 = vpop.eup %2521 }
 0x6fd   :  { %v563_v50 = vadd.f32 1.0, %v2522_v49  ;;  %v2524_v51 = vpop.eup %2523 }
 0x6fe   :  { %v664_v52 = vadd.f32 1.0, %v2524_v51 }
 0x6ff   :  { %2525 = vrcp.f32 %v563_v50 }
 0x700   :  { %2527 = vrcp.f32 %v664_v52 }
 0x70c   :  { %v2526_v53 = vpop.eup %2525 }
 0x70d   :  { %v2528_v56 = vpop.eup %2527  ;;  %v567_v59 = vmul.f32 %v2526_v53, %v3030_v14 }
 0x70e   :  { %v668_v62 = vmul.f32 %v2528_v56, %v3034_v17 }
 0x76a   :  { %v570_v54 = vpop.permute.xlu0 %569 }
 0x76b   :  { %v572_v55 = vmul.f32 %v2526_v53, %v570_v54 }
 0x76d   :  { %574 = vrot.lane.b32.xlu0 %v572_v55, %s2798_s8 }
 0x76e   :  { %v671_v57 = vpop.permute.xlu1 %670 }
 0x76f   :  { %v673_v58 = vmul.f32 %v2528_v56, %v671_v57 }
 0x771   :  { %675 = vrot.lane.b32.xlu1 %v673_v58, %s2798_s8 }
 0x7df   :  { %v575_v60 = vpop.permute.xlu0 %574 }
 0x7e0   :  { %v3088_v61 = vadd.f32 %v575_v60, %v567_v59 }
 0x7e2   :  { %2529 = vtanh.f32 %v3088_v61 }
 0x7e3   :  { %v676_v63 = vpop.permute.xlu1 %675 }
 0x7e4   :  { %v3092_v1 = vadd.f32 %v676_v63, %v668_v62 }
 0x7e6   :  { %2531 = vtanh.f32 %v3092_v1 }
 0x7ef   :  { %v2530_v5 = vpop.eup %2529 }
 0x7f0   :  { %580 = vrot.lane.b32.xlu0 %v2530_v5, %s2799_s20 }
 0x7f3   :  { %v2532_v9 = vpop.eup %2531 }
 0x7f4   :  { %681 = vrot.lane.b32.xlu1 %v2532_v9, %s2799_s20  ;;  %v141_v9 = vld [vmem:[#allocation2 + $0x20] sm:$0xff] }
 0x862   :  { %v581_v10 = vpop.permute.xlu0 %580 }
 0x863   :  { %v3097_v11 = vmul.f32 %v2526_v53, %v581_v10 }
 0x865   :  { %690 = vrot.lane.b32.xlu1 %v3097_v11, %s2799_s20 }
 0x866   :  { %v682_v13 = vpop.permute.xlu1 %681 }
 0x867   :  { %v684_v14 = vmul.f32 %v2528_v56, %v682_v13 }
 0x869   :  { %686 = vrot.lane.b32.xlu0 %v684_v14, %s2798_s8 }
 0x86d   :  { %791 = vrot.lane.b32.xlu0 %v684_v14, %s2800_s21 }
 0x8d7   :  { %v691_v15 = vpop.permute.xlu1 %690 }
 0x8db   :  { %v687_v16 = vpop.permute.xlu0 %686 }
 0x8dc   :  { %v693_v17 = vsel %vm267_vm3, %v687_v16, %v691_v15 }
 0x8dd   :  { %2286 = vmatmul.mubr.msk.f32.vlgmr.msra.gmra.mxu1 %vm275_vm4, %v693_v17 }
 0x8de   :  { %2323 = vmatpush3.msra.mxu1 %v2894_v2  ;;  %2334 = vmatprep.mubr.msk.f32.mxu1 %vm2796_vm0, %v2795_v0 }
 0x8df   :  { %v792_v19 = vpop.permute.xlu0 %791  ;;  %2324 = vmatprep.subr.mxu1 %v2795_v0 }
 0x8e0   :  { %v794_v20 = vsel %vm149_vm1, %v140_v18, %v792_v19  ;;  %2325 = vmatpush3.msra.mxu1 %v2896_v3 }
 0x8e1   :  { %2301 = vmatmul.mubr.msk.f32.vlgmr.msra.gmra.mxu0 %vm157_vm2, %v794_v20  ;;  %2326 = vmatprep.subr.mxu1 %v2795_v0 }
 0x8e2   :  { %2304 = vmatpush3.msra.mxu0 %v2946_v27  ;;  %2327 = vmatpush3.msra.mxu1 %v2900_v4 }
 0x8e3   :  { %2305 = vmatprep.subr.mxu0 %v2795_v0  ;;  %2328 = vmatprep.subr.mxu1 %v2795_v0 }
 0x8e4   :  { %2306 = vmatpush3.msra.mxu0 %v2948_v28  ;;  %2319 = vmatprep.mubr.msk.f32.mxu0 %vm2796_vm0, %v2795_v0 }
 0x8e5   :  { %2307 = vmatprep.subr.mxu0 %v2795_v0  ;;  %2329 = vmatpush3.msra.mxu1 %v2905_v6 }
 0x8e6   :  { %2308 = vmatpush3.msra.mxu0 %v2952_v29  ;;  %2330 = vmatprep.subr.mxu1 %v2795_v0 }
 0x8e7   :  { %2309 = vmatprep.subr.mxu0 %v2795_v0  ;;  %2331 = vmatpush3.msra.mxu1 %v2909_v7 }
 0x8e8   :  { %2310 = vmatpush3.msra.mxu0 %v2956_v30  ;;  %2332 = vmatprep.subr.mxu1 %v2795_v0 }
 0x8e9   :  { %2311 = vmatprep.subr.mxu0 %v2795_v0  ;;  %2333 = vmatpush3.msra.mxu1 %v2913_v8 }
 0x8ea   :  { %2312 = vmatpush3.msra.mxu0 %v2960_v32  ;;  %2337 = vmatprep.subr.mxu1 %v2795_v0 }
 0x8eb   :  { %2313 = vmatprep.subr.mxu0 %v2795_v0 }
 0x8ec   :  { %2314 = vmatpush3.msra.mxu0 %v2965_v34 }
 0x8ed   :  { %2315 = vmatprep.subr.mxu0 %v2795_v0 }
 0x8ee   :  { %2316 = vmatpush3.msra.mxu0 %v2969_v35 }
 0x8ef   :  { %2317 = vmatprep.subr.mxu0 %v2795_v0 }
 0x8f0   :  { %2318 = vmatpush3.msra.mxu0 %v2976_v36 }
 0x8f1   :  { %2356 = vmatprep.subr.mxu0 %v2795_v0 }
 0x99d   :  { %v763_v22 = vpop.f32.mrf.mxu1 }
 0x99e   :  { %v764_v23 = vadd.f32 %v3021_v45, %v763_v22 }
 0x99f   :  { %v2287_v24 = vpop.f32.mrf.mxu1 }
 0x9a0   :  { %2533 = vtanh.f32 %v764_v23  ;;  %v2016_v38 = vmul.f32 -1.442695, %v764_v23 }
 0x9a1   :  { %v864_v25 = vpop.f32.mrf.mxu0 }
 0x9a2   :  { %v865_v26 = vadd.f32 %v2938_v12, %v864_v25 }
 0x9a3   :  { %v2302_v31 = vpop.f32.mrf.mxu0 }
 0x9a4   :  { %2535 = vtanh.f32 %v865_v26  ;;  %v2018_v39 = vmul.f32 -1.442695, %v865_v26 }
 0x9a5   :  { %2537 = vpow2.f32 %v2016_v38 }
 0x9a6   :  { %2539 = vpow2.f32 %v2018_v39 }
 0x9ad   :  { %v2534_v33 = vpop.eup %2533 }
 0x9ae   :  { %776 = vrot.lane.b32.xlu1 %v2534_v33, %s2799_s20 }
 0x9b1   :  { %v2536_v37 = vpop.eup %2535 }
 0x9b2   :  { %877 = vrot.lane.b32.xlu0 %v2536_v37, %s2799_s20  ;;  %v2538_v40 = vpop.eup %2537 }
 0x9b3   :  { %v770_v41 = vadd.f32 1.0, %v2538_v40  ;;  %v2540_v42 = vpop.eup %2539 }
 0x9b4   :  { %v871_v43 = vadd.f32 1.0, %v2540_v42 }
 0x9b5   :  { %2541 = vrcp.f32 %v770_v41 }
 0x9b6   :  { %2543 = vrcp.f32 %v871_v43 }
 0x9c2   :  { %v2542_v44 = vpop.eup %2541 }
 0x9c3   :  { %v2544_v48 = vpop.eup %2543  ;;  %v774_v51 = vmul.f32 %v2542_v44, %v3088_v61 }
 0x9c4   :  { %v875_v54 = vmul.f32 %v2544_v48, %v3092_v1 }
 0xa20   :  { %v777_v46 = vpop.permute.xlu1 %776 }
 0xa21   :  { %v779_v47 = vmul.f32 %v2542_v44, %v777_v46 }
 0xa23   :  { %781 = vrot.lane.b32.xlu1 %v779_v47, %s2798_s8 }
 0xa24   :  { %v878_v49 = vpop.permute.xlu0 %877 }
 0xa25   :  { %v880_v50 = vmul.f32 %v2544_v48, %v878_v49 }
 0xa27   :  { %882 = vrot.lane.b32.xlu0 %v880_v50, %s2798_s8 }
 0xa95   :  { %v782_v52 = vpop.permute.xlu1 %781 }
 0xa96   :  { %v3146_v53 = vadd.f32 %v782_v52, %v774_v51 }
 0xa98   :  { %2545 = vtanh.f32 %v3146_v53 }
 0xa99   :  { %v883_v55 = vpop.permute.xlu0 %882 }
 0xa9a   :  { %v3150_v56 = vadd.f32 %v883_v55, %v875_v54 }
 0xa9c   :  { %2547 = vtanh.f32 %v3150_v56 }
 0xaa5   :  { %v2546_v57 = vpop.eup %2545 }
 0xaa6   :  { %787 = vrot.lane.b32.xlu1 %v2546_v57, %s2799_s20 }
 0xaa9   :  { %v2548_v58 = vpop.eup %2547 }
 0xaaa   :  { %888 = vrot.lane.b32.xlu0 %v2548_v58, %s2799_s20 }
 0xb18   :  { %v788_v59 = vpop.permute.xlu1 %787 }
 0xb19   :  { %v3155_v60 = vmul.f32 %v2542_v44, %v788_v59  ;;  %v142_v59 = vld [vmem:[#allocation2 + $0x28] sm:$0xff] }
 0xb1b   :  { %897 = vrot.lane.b32.xlu0 %v3155_v60, %s2799_s20 }
 0xb1c   :  { %v889_v61 = vpop.permute.xlu0 %888 }
 0xb1d   :  { %v891_v62 = vmul.f32 %v2544_v48, %v889_v61 }
 0xb1f   :  { %893 = vrot.lane.b32.xlu1 %v891_v62, %s2798_s8 }
 0xb23   :  { %998 = vrot.lane.b32.xlu1 %v891_v62, %s2800_s21 }
 0xb8d   :  { %v898_v63 = vpop.permute.xlu0 %897 }
 0xb91   :  { %v894_v1 = vpop.permute.xlu1 %893 }
 0xb92   :  { %v900_v5 = vsel %vm267_vm3, %v894_v1, %v898_v63 }
 0xb93   :  { %2320 = vmatmul.mubr.msk.f32.vlgmr.msra.gmra.mxu0 %vm275_vm4, %v900_v5 }
 0xb94   :  { %2357 = vmatpush3.msra.mxu0 %v2894_v2  ;;  %2368 = vmatprep.mubr.msk.f32.mxu0 %vm2796_vm0, %v2795_v0 }
 0xb95   :  { %v999_v10 = vpop.permute.xlu1 %998  ;;  %2358 = vmatprep.subr.mxu0 %v2795_v0 }
 0xb96   :  { %v1001_v13 = vsel %vm149_vm1, %v141_v9, %v999_v10  ;;  %2359 = vmatpush3.msra.mxu0 %v2896_v3 }
 0xb97   :  { %2335 = vmatmul.mubr.msk.f32.vlgmr.msra.gmra.mxu1 %vm157_vm2, %v1001_v13  ;;  %2360 = vmatprep.subr.mxu0 %v2795_v0 }
 0xb98   :  { %2338 = vmatpush3.msra.mxu1 %v2946_v27  ;;  %2361 = vmatpush3.msra.mxu0 %v2900_v4 }
 0xb99   :  { %2339 = vmatprep.subr.mxu1 %v2795_v0  ;;  %2362 = vmatprep.subr.mxu0 %v2795_v0 }
 0xb9a   :  { %2340 = vmatpush3.msra.mxu1 %v2948_v28  ;;  %2353 = vmatprep.mubr.msk.f32.mxu1 %vm2796_vm0, %v2795_v0 }
 0xb9b   :  { %2341 = vmatprep.subr.mxu1 %v2795_v0  ;;  %2363 = vmatpush3.msra.mxu0 %v2905_v6 }
 0xb9c   :  { %2342 = vmatpush3.msra.mxu1 %v2952_v29  ;;  %2364 = vmatprep.subr.mxu0 %v2795_v0 }
 0xb9d   :  { %2343 = vmatprep.subr.mxu1 %v2795_v0  ;;  %2365 = vmatpush3.msra.mxu0 %v2909_v7 }
 0xb9e   :  { %2344 = vmatpush3.msra.mxu1 %v2956_v30  ;;  %2366 = vmatprep.subr.mxu0 %v2795_v0 }
 0xb9f   :  { %2345 = vmatprep.subr.mxu1 %v2795_v0  ;;  %2367 = vmatpush3.msra.mxu0 %v2913_v8 }
 0xba0   :  { %2346 = vmatpush3.msra.mxu1 %v2960_v32  ;;  %2371 = vmatprep.subr.mxu0 %v2795_v0 }
 0xba1   :  { %2347 = vmatprep.subr.mxu1 %v2795_v0 }
 0xba2   :  { %2348 = vmatpush3.msra.mxu1 %v2965_v34 }
 0xba3   :  { %2349 = vmatprep.subr.mxu1 %v2795_v0 }
 0xba4   :  { %2350 = vmatpush3.msra.mxu1 %v2969_v35 }
 0xba5   :  { %2351 = vmatprep.subr.mxu1 %v2795_v0 }
 0xba6   :  { %2352 = vmatpush3.msra.mxu1 %v2976_v36 }
 0xba7   :  { %2390 = vmatprep.subr.mxu1 %v2795_v0 }
 0xc53   :  { %v970_v14 = vpop.f32.mrf.mxu0 }
 0xc54   :  { %v971_v15 = vadd.f32 %v3021_v45, %v970_v14 }
 0xc55   :  { %v2321_v16 = vpop.f32.mrf.mxu0 }
 0xc56   :  { %2549 = vtanh.f32 %v971_v15  ;;  %v2020_v23 = vmul.f32 -1.442695, %v971_v15 }
 0xc57   :  { %v1071_v17 = vpop.f32.mrf.mxu1 }
 0xc58   :  { %v1072_v18 = vadd.f32 %v2938_v12, %v1071_v17 }
 0xc59   :  { %v2336_v19 = vpop.f32.mrf.mxu1 }
 0xc5a   :  { %2551 = vtanh.f32 %v1072_v18  ;;  %v2022_v24 = vmul.f32 -1.442695, %v1072_v18 }
 0xc5b   :  { %2553 = vpow2.f32 %v2020_v23 }
 0xc5c   :  { %2555 = vpow2.f32 %v2022_v24 }
 0xc63   :  { %v2550_v20 = vpop.eup %2549 }
 0xc64   :  { %983 = vrot.lane.b32.xlu0 %v2550_v20, %s2799_s20 }
 0xc67   :  { %v2552_v22 = vpop.eup %2551 }
 0xc68   :  { %1084 = vrot.lane.b32.xlu1 %v2552_v22, %s2799_s20  ;;  %v2554_v25 = vpop.eup %2553 }
 0xc69   :  { %v977_v26 = vadd.f32 1.0, %v2554_v25  ;;  %v2556_v31 = vpop.eup %2555 }
 0xc6a   :  { %v1078_v33 = vadd.f32 1.0, %v2556_v31 }
 0xc6b   :  { %2557 = vrcp.f32 %v977_v26 }
 0xc6c   :  { %2559 = vrcp.f32 %v1078_v33 }
 0xc78   :  { %v2558_v37 = vpop.eup %2557 }
 0xc79   :  { %v2560_v40 = vpop.eup %2559  ;;  %v981_v43 = vmul.f32 %v2558_v37, %v3146_v53 }
 0xc7a   :  { %v1082_v47 = vmul.f32 %v2560_v40, %v3150_v56 }
 0xcd6   :  { %v984_v38 = vpop.permute.xlu0 %983 }
 0xcd7   :  { %v986_v39 = vmul.f32 %v2558_v37, %v984_v38 }
 0xcd9   :  { %988 = vrot.lane.b32.xlu0 %v986_v39, %s2798_s8 }
 0xcda   :  { %v1085_v41 = vpop.permute.xlu1 %1084 }
 0xcdb   :  { %v1087_v42 = vmul.f32 %v2560_v40, %v1085_v41 }
 0xcdd   :  { %1089 = vrot.lane.b32.xlu1 %v1087_v42, %s2798_s8 }
 0xd4b   :  { %v989_v44 = vpop.permute.xlu0 %988 }
 0xd4c   :  { %v3204_v46 = vadd.f32 %v989_v44, %v981_v43 }
 0xd4e   :  { %2561 = vtanh.f32 %v3204_v46 }
 0xd4f   :  { %v1090_v48 = vpop.permute.xlu1 %1089 }
 0xd50   :  { %v3208_v49 = vadd.f32 %v1090_v48, %v1082_v47  ;;  %v2621_v47 = vld [vmem:[#allocation5 + $0x28] sm:$0xff] }
 0xd52   :  { %2563 = vtanh.f32 %v3208_v49 }
 0xd5b   :  { %v2562_v50 = vpop.eup %2561 }
 0xd5c   :  { %994 = vrot.lane.b32.xlu0 %v2562_v50, %s2799_s20  ;;  %v2622_v50 = vld [vmem:[#allocation5 + $0x20] sm:$0xff] }
 0xd5f   :  { %v2564_v51 = vpop.eup %2563 }
 0xd60   :  { %1095 = vrot.lane.b32.xlu1 %v2564_v51, %s2799_s20  ;;  %v2623_v51 = vld [vmem:[#allocation5 + $0x18] sm:$0xff] }
 0xdce   :  { %v995_v52 = vpop.permute.xlu0 %994 }
 0xdcf   :  { %v3213_v53 = vmul.f32 %v2558_v37, %v995_v52  ;;  %v2624_v52 = vld [vmem:[#allocation5 + $0x10] sm:$0xff] }
 0xdd1   :  { %1104 = vrot.lane.b32.xlu1 %v3213_v53, %s2799_s20 }
 0xdd2   :  { %v1096_v54 = vpop.permute.xlu1 %1095 }
 0xdd3   :  { %v1098_v55 = vmul.f32 %v2560_v40, %v1096_v54 }
 0xdd5   :  { %1100 = vrot.lane.b32.xlu0 %v1098_v55, %s2798_s8 }
 0xdd9   :  { %1205 = vrot.lane.b32.xlu0 %v1098_v55, %s2800_s21  ;;  %v3310_v55 = vld [vmem:[%s3398_s2] ss:$0 sm:$0xff] }
 0xe43   :  { %v1105_v56 = vpop.permute.xlu1 %1104 }
 0xe47   :  { %v1101_v57 = vpop.permute.xlu0 %1100 }
 0xe48   :  { %v1107_v58 = vsel %vm267_vm3, %v1101_v57, %v1105_v56 }
 0xe49   :  { %2354 = vmatmul.mubr.msk.f32.vlgmr.msra.gmra.mxu1 %vm275_vm4, %v1107_v58 }
 0xe4a   :  { %2391 = vmatpush3.msra.mxu1 %v2894_v2  ;;  %2402 = vmatprep.mubr.msk.f32.mxu1 %vm2796_vm0, %v2795_v0 }
 0xe4b   :  { %v1206_v61 = vpop.permute.xlu0 %1205  ;;  %2392 = vmatprep.subr.mxu1 %v2795_v0 }
 0xe4c   :  { %v1208_v62 = vsel %vm149_vm1, %v142_v59, %v1206_v61  ;;  %2393 = vmatpush3.msra.mxu1 %v2896_v3 }
 0xe4d   :  { %2369 = vmatmul.mubr.msk.f32.vlgmr.msra.gmra.mxu0 %vm157_vm2, %v1208_v62  ;;  %2394 = vmatprep.subr.mxu1 %v2795_v0 }
 0xe4e   :  { %2372 = vmatpush3.msra.mxu0 %v2946_v27  ;;  %2395 = vmatpush3.msra.mxu1 %v2900_v4 }
 0xe4f   :  { %2373 = vmatprep.subr.mxu0 %v2795_v0  ;;  %2396 = vmatprep.subr.mxu1 %v2795_v0 }
 0xe50   :  { %2374 = vmatpush3.msra.mxu0 %v2948_v28  ;;  %2387 = vmatprep.mubr.msk.f32.mxu0 %vm2796_vm0, %v2795_v0 }
 0xe51   :  { %2375 = vmatprep.subr.mxu0 %v2795_v0  ;;  %2397 = vmatpush3.msra.mxu1 %v2905_v6 }
 0xe52   :  { %2376 = vmatpush3.msra.mxu0 %v2952_v29  ;;  %2398 = vmatprep.subr.mxu1 %v2795_v0 }
 0xe53   :  { %2377 = vmatprep.subr.mxu0 %v2795_v0  ;;  %2399 = vmatpush3.msra.mxu1 %v2909_v7 }
 0xe54   :  { %2378 = vmatpush3.msra.mxu0 %v2956_v30  ;;  %2400 = vmatprep.subr.mxu1 %v2795_v0 }
 0xe55   :  { %2379 = vmatprep.subr.mxu0 %v2795_v0  ;;  %2401 = vmatpush3.msra.mxu1 %v2913_v8 }
 0xe56   :  { %2380 = vmatpush3.msra.mxu0 %v2960_v32  ;;  %2405 = vmatprep.subr.mxu1 %v2795_v0 }
 0xe57   :  { %2381 = vmatprep.subr.mxu0 %v2795_v0 }
 0xe58   :  { %2382 = vmatpush3.msra.mxu0 %v2965_v34 }
 0xe59   :  { %2383 = vmatprep.subr.mxu0 %v2795_v0 }
 0xe5a   :  { %2384 = vmatpush3.msra.mxu0 %v2969_v35 }
 0xe5b   :  { %2385 = vmatprep.subr.mxu0 %v2795_v0 }
 0xe5c   :  { %2386 = vmatpush3.msra.mxu0 %v2976_v36 }
 0xe5d   :  { %2424 = vmatprep.subr.mxu0 %v2795_v0 }
 0xf09   :  { %v1177_v2 = vpop.f32.mrf.mxu1 }
 0xf0a   :  { %v1178_v3 = vadd.f32 %v3021_v45, %v1177_v2 }
 0xf0b   :  { %v2355_v4 = vpop.f32.mrf.mxu1 }
 0xf0c   :  { %2565 = vtanh.f32 %v1178_v3  ;;  %v2024_v5 = vmul.f32 -1.442695, %v1178_v3 }
 0xf0d   :  { %v1278_v6 = vpop.f32.mrf.mxu0 }
 0xf0e   :  { %v1279_v7 = vadd.f32 %v2938_v12, %v1278_v6 }
 0xf0f   :  { %v2370_v8 = vpop.f32.mrf.mxu0 }
 0xf10   :  { %2567 = vtanh.f32 %v1279_v7  ;;  %v2026_v9 = vmul.f32 -1.442695, %v1279_v7 }
 0xf11   :  { %2569 = vpow2.f32 %v2024_v5 }
 0xf12   :  { %2571 = vpow2.f32 %v2026_v9 }
 0xf19   :  { %v2566_v63 = vpop.eup %2565 }
 0xf1a   :  { %1190 = vrot.lane.b32.xlu1 %v2566_v63, %s2799_s20 }
 0xf1d   :  { %v2568_v1 = vpop.eup %2567 }
 0xf1e   :  { %1291 = vrot.lane.b32.xlu0 %v2568_v1, %s2799_s20  ;;  %v2570_v10 = vpop.eup %2569 }
 0xf1f   :  { %v1184_v13 = vadd.f32 1.0, %v2570_v10  ;;  %v2572_v14 = vpop.eup %2571 }
 0xf20   :  { %v1285_v15 = vadd.f32 1.0, %v2572_v14 }
 0xf21   :  { %2573 = vrcp.f32 %v1184_v13 }
 0xf22   :  { %2575 = vrcp.f32 %v1285_v15 }
 0xf2e   :  { %v2574_v16 = vpop.eup %2573 }
 0xf2f   :  { %v2576_v18 = vpop.eup %2575  ;;  %v1188_v22 = vmul.f32 %v2574_v16, %v3204_v46  ;;  %v143_v46 = vld [vmem:[#allocation2 + $0x30] sm:$0xff] }
 0xf30   :  { %v1289_v25 = vmul.f32 %v2576_v18, %v3208_v49 }
 0xf8c   :  { %v1191_v12 = vpop.permute.xlu1 %1190 }
 0xf8d   :  { %v1193_v17 = vmul.f32 %v2574_v16, %v1191_v12 }
 0xf8f   :  { %1195 = vrot.lane.b32.xlu1 %v1193_v17, %s2798_s8 }
 0xf90   :  { %v1292_v19 = vpop.permute.xlu0 %1291 }
 0xf91   :  { %v1294_v20 = vmul.f32 %v2576_v18, %v1292_v19 }
 0xf93   :  { %1296 = vrot.lane.b32.xlu0 %v1294_v20, %s2798_s8 }
0x1001   :  { %v1196_v23 = vpop.permute.xlu1 %1195 }
0x1002   :  { %v3262_v24 = vadd.f32 %v1196_v23, %v1188_v22  ;;  %v144_v23 = vld [vmem:[#allocation2 + $0x38] sm:$0xff] }
0x1004   :  { %2577 = vtanh.f32 %v3262_v24 }
0x1005   :  { %v1297_v26 = vpop.permute.xlu0 %1296 }
0x1006   :  { %v3266_v31 = vadd.f32 %v1297_v26, %v1289_v25  ;;  %v2628_v26 = vld [vmem:[#allocation7 + $0x38] sm:$0xff] }
0x1008   :  { %2579 = vtanh.f32 %v3266_v31 }
0x1011   :  { %v2578_v33 = vpop.eup %2577 }
0x1012   :  { %1201 = vrot.lane.b32.xlu1 %v2578_v33, %s2799_s20  ;;  %v2630_v33 = vld [vmem:[#allocation7 + $0x28] sm:$0xff] }
0x1015   :  { %v2580_v37 = vpop.eup %2579 }
0x1016   :  { %1302 = vrot.lane.b32.xlu0 %v2580_v37, %s2799_s20  ;;  %v2631_v37 = vld [vmem:[#allocation7 + $0x20] sm:$0xff] }
0x1084   :  { %v1202_v38 = vpop.permute.xlu1 %1201 }
0x1085   :  { %v3271_v39 = vmul.f32 %v2574_v16, %v1202_v38  ;;  %v2632_v38 = vld [vmem:[#allocation7 + $0x18] sm:$0xff] }
0x1087   :  { %1311 = vrot.lane.b32.xlu0 %v3271_v39, %s2799_s20 }
0x1088   :  { %v1303_v40 = vpop.permute.xlu0 %1302 }
0x1089   :  { %v1305_v41 = vmul.f32 %v2576_v18, %v1303_v40  ;;  %v2633_v40 = vld [vmem:[#allocation7 + $0x10] sm:$0xff] }
0x108b   :  { %1307 = vrot.lane.b32.xlu1 %v1305_v41, %s2798_s8 }
0x108f   :  { %1412 = vrot.lane.b32.xlu1 %v1305_v41, %s2800_s21  ;;  %v2634_v41 = vld [vmem:[#allocation7 + $0x8] sm:$0xff] }
0x10f9   :  { %v1312_v42 = vpop.permute.xlu0 %1311 }
0x10fd   :  { %v1308_v43 = vpop.permute.xlu1 %1307 }
0x10fe   :  { %v1314_v44 = vsel %vm267_vm3, %v1308_v43, %v1312_v42  ;;  %v2635_v42 = vld [vmem:[#allocation7] sm:$0xff] }
0x10ff   :  { %2388 = vmatmul.mubr.msk.f32.vlgmr.msra.gmra.mxu0 %vm275_vm4, %v1314_v44  ;;  %v2636_v44 = vld [vmem:[%s3400_s4] ss:$0 sm:$0xff] }
0x1100   :  { %2425 = vmatpush3.msra.mxu0 %v2621_v47  ;;  %2436 = vmatprep.mubr.msk.f32.mxu0 %vm2796_vm0, %v2795_v0 }
0x1101   :  { %v1413_v48 = vpop.permute.xlu1 %1412  ;;  %2426 = vmatprep.subr.mxu0 %v2795_v0 }
0x1102   :  { %v1415_v49 = vsel %vm149_vm1, %v143_v46, %v1413_v48  ;;  %2427 = vmatpush3.msra.mxu0 %v2622_v50 }
0x1103   :  { %2403 = vmatmul.mubr.msk.f32.vlgmr.msra.gmra.mxu1 %vm157_vm2, %v1415_v49  ;;  %2428 = vmatprep.subr.mxu0 %v2795_v0 }
0x1104   :  { %2406 = vmatpush3.msra.mxu1 %v2946_v27  ;;  %2429 = vmatpush3.msra.mxu0 %v2623_v51  ;;  %v2625_v27 = vld [vmem:[#allocation5 + $0x8] sm:$0xff] }
0x1105   :  { %2407 = vmatprep.subr.mxu1 %v2795_v0  ;;  %2430 = vmatprep.subr.mxu0 %v2795_v0 }
0x1106   :  { %2408 = vmatpush3.msra.mxu1 %v2948_v28  ;;  %2421 = vmatprep.mubr.msk.f32.mxu1 %vm2796_vm0, %v2795_v0  ;;  %v2626_v28 = vld [vmem:[#allocation5] sm:$0xff] }
0x1107   :  { %2409 = vmatprep.subr.mxu1 %v2795_v0  ;;  %2431 = vmatpush3.msra.mxu0 %v2624_v52 }
0x1108   :  { %2410 = vmatpush3.msra.mxu1 %v2952_v29  ;;  %2432 = vmatprep.subr.mxu0 %v2795_v0 }
0x1109   :  { %2411 = vmatprep.subr.mxu1 %v2795_v0  ;;  %2433 = vmatpush3.msra.mxu0 %v2625_v27 }
0x110a   :  { %2412 = vmatpush3.msra.mxu1 %v2956_v30  ;;  %2434 = vmatprep.subr.mxu0 %v2795_v0 }
0x110b   :  { %2413 = vmatprep.subr.mxu1 %v2795_v0  ;;  %2435 = vmatpush3.msra.mxu0 %v2626_v28 }
0x110c   :  { %2414 = vmatpush3.msra.mxu1 %v2960_v32  ;;  %2439 = vmatprep.subr.mxu0 %v2795_v0 }
0x110d   :  { %2415 = vmatprep.subr.mxu1 %v2795_v0 }
0x110e   :  { %2416 = vmatpush3.msra.mxu1 %v2965_v34 }
0x110f   :  { %2417 = vmatprep.subr.mxu1 %v2795_v0 }
0x1110   :  { %2418 = vmatpush3.msra.mxu1 %v2969_v35 }
0x1111   :  { %2419 = vmatprep.subr.mxu1 %v2795_v0 }
0x1112   :  { %2420 = vmatpush3.msra.mxu1 %v2976_v36 }
0x11bf   :  { %v1384_v29 = vpop.f32.mrf.mxu0 }
0x11c0   :  { %v1385_v30 = vadd.f32 %v3021_v45, %v1384_v29 }
0x11c1   :  { %v2389_v54 = vpop.f32.mrf.mxu0 }
0x11c2   :  { %2581 = vtanh.f32 %v1385_v30  ;;  %v2028_v36 = vmul.f32 -1.442695, %v1385_v30 }
0x11c3   :  { %v1485_v32 = vpop.f32.mrf.mxu1 }
0x11c4   :  { %v1486_v34 = vadd.f32 %v3310_v55, %v1485_v32 }
0x11c5   :  { %v2404_v56 = vpop.f32.mrf.mxu1 }
0x11c6   :  { %2583 = vtanh.f32 %v1486_v34  ;;  %v2030_v45 = vmul.f32 -1.442695, %v1486_v34 }
0x11c7   :  { %2585 = vpow2.f32 %v2028_v36 }
0x11c8   :  { %2587 = vpow2.f32 %v2030_v45 }
0x11cf   :  { %v2582_v35 = vpop.eup %2581 }
0x11d0   :  { %1397 = vrot.lane.b32.xlu0 %v2582_v35, %s2799_s20 }
0x11d3   :  { %v2584_v57 = vpop.eup %2583 }
0x11d4   :  { %1498 = vrot.lane.b32.xlu1 %v2584_v57, %s2799_s20  ;;  %v2586_v58 = vpop.eup %2585 }
0x11d5   :  { %v1391_v59 = vadd.f32 1.0, %v2586_v58  ;;  %v2588_v61 = vpop.eup %2587 }
0x11d6   :  { %v1492_v62 = vadd.f32 1.0, %v2588_v61 }
0x11d7   :  { %2589 = vrcp.f32 %v1391_v59 }
0x11d8   :  { %2591 = vrcp.f32 %v1492_v62 }
0x11e4   :  { %v2590_v2 = vpop.eup %2589 }
0x11e5   :  { %v2592_v6 = vpop.eup %2591  ;;  %v1395_v63 = vmul.f32 %v2590_v2, %v3262_v24 }
0x11e6   :  { %v1496_v9 = vmul.f32 %v2592_v6, %v3266_v31  ;;  %v2629_v31 = vld [vmem:[#allocation7 + $0x30] sm:$0xff] }
0x1242   :  { %v1398_v3 = vpop.permute.xlu0 %1397 }
0x1243   :  { %v1400_v4 = vmul.f32 %v2590_v2, %v1398_v3 }
0x1245   :  { %1402 = vrot.lane.b32.xlu0 %v1400_v4, %s2798_s8 }
0x1246   :  { %v1499_v7 = vpop.permute.xlu1 %1498 }
0x1247   :  { %v1501_v8 = vmul.f32 %v2592_v6, %v1499_v7 }
0x1249   :  { %1503 = vrot.lane.b32.xlu1 %v1501_v8, %s2798_s8 }
0x12b7   :  { %v1403_v1 = vpop.permute.xlu0 %1402 }
0x12b8   :  { %v3318_v5 = vadd.f32 %v1403_v1, %v1395_v63 }
0x12ba   :  { %2593 = vtanh.f32 %v3318_v5 }
0x12bb   :  { %v1504_v10 = vpop.permute.xlu1 %1503 }
0x12bc   :  { %v3322_v13 = vadd.f32 %v1504_v10, %v1496_v9 }
0x12be   :  { %2595 = vtanh.f32 %v3322_v13 }
0x12c7   :  { %v2594_v14 = vpop.eup %2593 }
0x12c8   :  { %1408 = vrot.lane.b32.xlu0 %v2594_v14, %s2799_s20 }
0x12cb   :  { %v2596_v15 = vpop.eup %2595 }
0x12cc   :  { %1509 = vrot.lane.b32.xlu1 %v2596_v15, %s2799_s20 }
0x133a   :  { %v1409_v16 = vpop.permute.xlu0 %1408 }
0x133b   :  { %v3327_v12 = vmul.f32 %v2590_v2, %v1409_v16 }
0x133d   :  { %1518 = vrot.lane.b32.xlu1 %v3327_v12, %s2799_s20 }
0x133e   :  { %v1510_v17 = vpop.permute.xlu1 %1509 }
0x133f   :  { %v1512_v18 = vmul.f32 %v2592_v6, %v1510_v17 }
0x1341   :  { %1514 = vrot.lane.b32.xlu0 %v1512_v18, %s2798_s8 }
0x1345   :  { %1619 = vrot.lane.b32.xlu0 %v1512_v18, %s2800_s21 }
0x13af   :  { %v1519_v19 = vpop.permute.xlu1 %1518 }
0x13b3   :  { %v1515_v20 = vpop.permute.xlu0 %1514 }
0x13b4   :  { %v1521_v22 = vsel %vm267_vm3, %v1515_v20, %v1519_v19 }
0x13b5   :  { %2422 = vmatmul.mubr.msk.f32.vlgmr.msra.gmra.mxu1 %vm275_vm4, %v1521_v22  ;;  %v1829_v22 = vld [vmem:[#allocation8 + $0x18] sm:$0xff] }
0x13b6   :  { %2458 = vmatprep.subr.mxu1 %v1829_v22 }
0x13b7   :  { %v1620_v24 = vpop.permute.xlu0 %1619  ;;  %2459 = vmatpush3.msra.mxu1 %v1829_v22 }
0x13b8   :  { %v1622_v25 = vsel %vm149_vm1, %v144_v23, %v1620_v24  ;;  %v1828_v23 = vld [vmem:[#allocation8 + $0x10] sm:$0xff] }
0x13b9   :  { %2437 = vmatmul.mubr.msk.f32.vlgmr.msra.gmra.mxu0 %vm157_vm2, %v1622_v25  ;;  %2460 = vmatprep.subr.mxu1 %v1828_v23 }
0x13ba   :  { %2440 = vmatpush3.msra.mxu0 %v2628_v26  ;;  %2455 = vmatprep.mubr.msk.f32.mxu0 %vm2796_vm0, %v2795_v0 }
0x13bb   :  { %2441 = vmatprep.subr.mxu0 %v2795_v0  ;;  %2461 = vmatpush3.msra.mxu1 %v1828_v23 }
0x13bc   :  { %2442 = vmatpush3.msra.mxu0 %v2629_v31  ;;  %v1827_v31 = vld [vmem:[#allocation8 + $0x8] sm:$0xff] }
0x13bd   :  { %2443 = vmatprep.subr.mxu0 %v2795_v0  ;;  %2462 = vmatprep.subr.mxu1 %v1827_v31 }
0x13be   :  { %2444 = vmatpush3.msra.mxu0 %v2630_v33  ;;  %v1826_v33 = vld [vmem:[#allocation8] sm:$0xff]  ;;  %2463 = vmatpush3.msra.mxu1 %v1827_v31 }
0x13bf   :  { %2445 = vmatprep.subr.mxu0 %v2795_v0  ;;  %2464 = vmatprep.subr.mxu1 %v1826_v33 }
0x13c0   :  { %2446 = vmatpush3.msra.mxu0 %v2631_v37  ;;  %2465 = vmatpush3.msra.mxu1 %v1826_v33 }
0x13c1   :  { %2447 = vmatprep.subr.mxu0 %v2795_v0 }
0x13c2   :  { %2448 = vmatpush3.msra.mxu0 %v2632_v38 }
0x13c3   :  { %2449 = vmatprep.subr.mxu0 %v2795_v0 }
0x13c4   :  { %2450 = vmatpush3.msra.mxu0 %v2633_v40 }
0x13c5   :  { %2451 = vmatprep.subr.mxu0 %v2795_v0 }
0x13c6   :  { %2452 = vmatpush3.msra.mxu0 %v2634_v41 }
0x13c7   :  { %2453 = vmatprep.subr.mxu0 %v2795_v0 }
0x13c8   :  { %2454 = vmatpush3.msra.mxu0 %v2635_v42 }
0x1475   :  { %v1591_v43 = vpop.f32.mrf.mxu1 }
0x1476   :  { %v1592_v46 = vadd.f32 %v2636_v44, %v1591_v43  ;;  %v2037_v43 = vld [vmem:[%s3402_s6] ss:$0 sm:$0xff]  ;;  %s2801_s6 = smov [#allocation13]  }
0x1477   :  { %v2423_v47 = vpop.f32.mrf.mxu1  ;;  %s1988_s5 = sshll.u32 %s2801_s6, 4  ;;  %s1989_s5 = int_to_ptr.vmem [resolvable:$true] %s1988_s5 }
0x1478   :  { %2597 = vtanh.f32 %v1592_v46  ;;  %v2032_v0 = vmul.f32 -1.442695, %v1592_v46  ;;  %s2757_s27 = scalar_lea.vmem %s1989_s5, 1024  ;;  %p2762_p3 = scmp.lt.s32.totalorder %s1989_s5, %s1989_s5 }
0x1479   :  { %v1692_v48 = vpop.f32.mrf.mxu0  ;;  %p2758_p2 = scmp.ne.s32.totalorder %s1989_s5, %s2757_s27  ;;  %p2763_p4 = scmp.lt.s32.totalorder %s2757_s27, %s2757_s27 }
0x147a   :  { %v1693_v49 = vadd.f32 %v3310_v55, %v1692_v48 }
0x147b   :  { %v2438_v50 = vpop.f32.mrf.mxu0  ;;  %p2764_p5 = por %p2763_p4, %p2762_p3 }
0x147c   :  { %2599 = vtanh.f32 %v1693_v49  ;;  %v2034_v27 = vmul.f32 -1.442695, %v1693_v49 }
0x147d   :  { %2601 = vpow2.f32 %v2032_v0  ;;  %p2765_p6 = pnand %p2764_p5, %p2758_p2 }
0x147e   :  { %2603 = vpow2.f32 %v2034_v27 }
0x1485   :  { %v2598_v51 = vpop.eup %2597 }
0x1486   :  { %1604 = vrot.lane.b32.xlu1 %v2598_v51, %s2799_s20 }
0x1489   :  { %v2600_v52 = vpop.eup %2599 }
0x148a   :  { %1705 = vrot.lane.b32.xlu0 %v2600_v52, %s2799_s20  ;;  %v2602_v28 = vpop.eup %2601 }
0x148b   :  { %v1598_v29 = vadd.f32 1.0, %v2602_v28  ;;  %v2604_v30 = vpop.eup %2603 }
0x148c   :  { %v1699_v54 = vadd.f32 1.0, %v2604_v30 }
0x148d   :  { %2605 = vrcp.f32 %v1598_v29 }
0x148e   :  { %2607 = vrcp.f32 %v1699_v54 }
0x149a   :  { %v2606_v32 = vpop.eup %2605 }
0x149b   :  { %v2608_v56 = vpop.eup %2607  ;;  %v1602_v36 = vmul.f32 %v2606_v32, %v3318_v5 }
0x149c   :  { %v1703_v59 = vmul.f32 %v2608_v56, %v3322_v13 }
0x14f8   :  { %v1605_v55 = vpop.permute.xlu1 %1604 }
0x14f9   :  { %v1607_v34 = vmul.f32 %v2606_v32, %v1605_v55 }
0x14fb   :  { %1609 = vrot.lane.b32.xlu1 %v1607_v34, %s2798_s8 }
0x14fc   :  { %v1706_v35 = vpop.permute.xlu0 %1705 }
0x14fd   :  { %v1708_v57 = vmul.f32 %v2608_v56, %v1706_v35 }
0x14ff   :  { %1710 = vrot.lane.b32.xlu0 %v1708_v57, %s2798_s8 }
0x156d   :  { %v1610_v45 = vpop.permute.xlu1 %1609 }
0x156e   :  { %v1612_v58 = vadd.f32 %v1610_v45, %v1602_v36 }
0x1570   :  { %2609 = vtanh.f32 %v1612_v58 }
0x1571   :  { %v1711_v61 = vpop.permute.xlu0 %1710 }
0x1572   :  { %v1713_v62 = vadd.f32 %v1711_v61, %v1703_v59 }
0x1574   :  { %2611 = vtanh.f32 %v1713_v62 }
0x157d   :  { %v2610_v2 = vpop.eup %2609 }
0x157e   :  { %1615 = vrot.lane.b32.xlu1 %v2610_v2, %s2799_s20 }
0x1581   :  { %v2612_v3 = vpop.eup %2611 }
0x1582   :  { %1716 = vrot.lane.b32.xlu0 %v2612_v3, %s2799_s20 }
0x15f0   :  { %v1616_v4 = vpop.permute.xlu1 %1615 }
0x15f1   :  { %v1618_v6 = vmul.f32 %v2606_v32, %v1616_v4 }
0x15f3   :  { %1725 = vrot.lane.b32.xlu0 %v1618_v6, %s2799_s20 }
0x15f4   :  { %v1717_v7 = vpop.permute.xlu0 %1716 }
0x15f5   :  { %v1719_v8 = vmul.f32 %v2608_v56, %v1717_v7 }
0x15f7   :  { %1721 = vrot.lane.b32.xlu1 %v1719_v8, %s2798_s8 }
0x1665   :  { %v1726_v63 = vpop.permute.xlu0 %1725 }
0x1669   :  { %v1722_v1 = vpop.permute.xlu1 %1721 }
0x166a   :  { %v1728_v5 = vsel %vm267_vm3, %v1722_v1, %v1726_v63 }
0x166b   :  { %2456 = vmatmul.mubr.msk.f32.vlgmr.msra.gmra.mxu0 %vm275_vm4, %v1728_v5 }
0x172b   :  { %v1798_v9 = vpop.f32.mrf.mxu0 }
0x172c   :  { %v1799_v10 = vadd.f32 %v2636_v44, %v1798_v9 }
0x172d   :  { %v2457_v13 = vpop.f32.mrf.mxu0 }
0x172e   :  { %2613 = vtanh.f32 %v1799_v10  ;;  %v2036_v15 = vmul.f32 -1.442695, %v1799_v10 }
0x1730   :  { %2615 = vpow2.f32 %v2036_v15 }
0x173b   :  { %v2614_v14 = vpop.eup %2613 }
0x173c   :  { %1811 = vrot.lane.b32.xlu1 %v2614_v14, %s2799_s20 }
0x173d   :  { %v2616_v16 = vpop.eup %2615 }
0x173e   :  { %v1805_v17 = vadd.f32 1.0, %v2616_v16 }
0x1740   :  { %2617 = vrcp.f32 %v1805_v17 }
0x174d   :  { %v2618_v18 = vpop.eup %2617 }
0x174e   :  { %v1809_v24 = vmul.f32 %v2618_v18, %v1612_v58 }
0x17ae   :  { %v1812_v19 = vpop.permute.xlu1 %1811 }
0x17af   :  { %v1814_v20 = vmul.f32 %v2618_v18, %v1812_v19 }
0x17b1   :  { %1816 = vrot.lane.b32.xlu0 %v1814_v20, %s2798_s8 }
0x17b5   :  { %1838 = vrot.lane.b32.xlu0 %v3039_v21, %s2798_s8 }
0x17b9   :  { %1842 = vrot.lane.b32.xlu0 %v3155_v60, %s2798_s8 }
0x17bd   :  { %1846 = vrot.lane.b32.xlu0 %v3271_v39, %s2798_s8 }
0x17c1   :  { %1850 = vrot.lane.b32.xlu0 %v1618_v6, %s2798_s8 }
0x1823   :  { %v1817_v25 = vpop.permute.xlu0 %1816 }
0x1824   :  { %v1819_v26 = vadd.f32 %v1817_v25, %v1809_v24 }
0x1826   :  { %2619 = vtanh.f32 %v1819_v26 }
0x1827   :  { %v1839_v21 = vpop.permute.xlu0 %1838 }
0x1828   :  { %2466 = vmatprep.mubr.msk.f32.mxu1 %vm267_vm3, %v1839_v21 }
0x182b   :  { %v1843_v37 = vpop.permute.xlu0 %1842 }
0x182f   :  { %v1847_v41 = vpop.permute.xlu0 %1846 }
0x1833   :  { %v2620_v60 = vpop.eup %2619 }
0x1834   :  { %1822 = vrot.lane.b32.xlu1 %v2620_v60, %s2799_s20 }
0x1838   :  { %1840 = vrot.lane.b32.xlu1 %v3097_v11, %s2798_s8 }
0x183c   :  { %1844 = vrot.lane.b32.xlu1 %v3213_v53, %s2798_s8  ;;  %v1851_v53 = vpop.permute.xlu0 %1850 }
0x1840   :  { %1848 = vrot.lane.b32.xlu1 %v3327_v12, %s2798_s8 }
0x18a6   :  { %v1823_v39 = vpop.permute.xlu1 %1822 }
0x18a7   :  { %v1825_v38 = vmul.f32 %v2618_v18, %v1823_v39 }
0x18a9   :  { %1852 = vrot.lane.b32.xlu1 %v1825_v38, %s2798_s8 }
0x18aa   :  { %v1841_v40 = vpop.permute.xlu1 %1840 }
0x18ab   :  { %2467 = vmatmul.mubr.msk.f32.vlgmr.msra.gmra.mxu1 %vm267_vm3, %v1841_v40 }
0x18ac   :  { %2469 = vmatprep.mubr.msk.f32.mxu1 %vm267_vm3, %v1843_v37 }
0x18ae   :  { %v1845_v42 = vpop.permute.xlu1 %1844 }
0x18af   :  { %2470 = vmatmul.mubr.msk.f32.gmra.mxu1 %vm267_vm3, %v1845_v42 }
0x18b0   :  { %2472 = vmatprep.mubr.msk.f32.mxu1 %vm267_vm3, %v1847_v41 }
0x18b2   :  { %v1849_v11 = vpop.permute.xlu1 %1848 }
0x18b3   :  { %2473 = vmatmul.mubr.msk.f32.gmra.mxu1 %vm267_vm3, %v1849_v11 }
0x18b4   :  { %2475 = vmatprep.mubr.msk.f32.mxu1 %vm267_vm3, %v1851_v53 }
0x191b   :  { %v1853_v12 = vpop.permute.xlu1 %1852 }
0x191c   :  { %2476 = vmatmul.mubr.msk.f32.gmra.mxu1 %vm267_vm3, %v1853_v12 }
0x196b   :  { %v2468_v44 = vpop.f32.mrf.mxu1 }
0x196c   :  { %v1942_v46 = vadd.f32 %v2468_v44, %v2037_v43 }
0x196d   :  { %v1936_v47 = vpop.f32.mrf.mxu1 }
0x196e   :  { %1976 = vst [vmem:[#allocation13 + $0x8] sm:$0xff] %v1942_v46  ;;  %v1937_v48 = vadd.f32 %v2037_v43, %v1936_v47 }
0x196f   :  { %v2471_v49 = vpop.f32.mrf.mxu1 }
0x1970   :  { %1975 = vst [vmem:[#allocation13] sm:$0xff] %v1937_v48  ;;  %v1952_v50 = vadd.f32 %v2471_v49, %v2037_v43 }
0x1971   :  { %v1946_v51 = vpop.f32.mrf.mxu1 }
0x1972   :  { %1978 = vst [vmem:[#allocation13 + $0x18] sm:$0xff] %v1952_v50  ;;  %v1947_v52 = vadd.f32 %v2037_v43, %v1946_v51 }
0x1973   :  { %v2474_v0 = vpop.f32.mrf.mxu1 }
0x1974   :  { %1977 = vst [vmem:[#allocation13 + $0x10] sm:$0xff] %v1947_v52  ;;  %v1962_v27 = vadd.f32 %v2474_v0, %v2037_v43 }
0x1975   :  { %v1956_v28 = vpop.f32.mrf.mxu1 }
0x1976   :  { %1980 = vst [vmem:[#allocation13 + $0x28] sm:$0xff] %v1962_v27  ;;  %v1957_v29 = vadd.f32 %v2037_v43, %v1956_v28 }
0x1978   :  { %1979 = vst [vmem:[#allocation13 + $0x20] sm:$0xff] %v1957_v29 }
0x19dc   :  { %v2477_v30 = vpop.f32.mrf.mxu1 }
0x19dd   :  { %v1972_v54 = vadd.f32 %v2477_v30, %v2037_v43 }
0x19de   :  { %v1966_v32 = vpop.f32.mrf.mxu1 }
0x19df   :  { %1982 = vst [vmem:[#allocation13 + $0x38] sm:$0xff] %v1972_v54  ;;  %v1967_v55 = vadd.f32 %v2037_v43, %v1966_v32 }
0x19e1   :  { %1981 = vst [vmem:[#allocation13 + $0x30] sm:$0xff] %v1967_v55 }
0x19e2   :  { %2768 = shalt.err (!%p2765_p6)
}
0x19e3   :  { %1994 = dma.vmem_to_hbm [thread:$0]  %s1989_s5, 1024, %s3405_s9, [#allocation4], %s2789_s14, %s2789_s14, %s2790_s15  }
0x19e4   :  { %2785 = dma.done.wait [#allocation4], 1024  }
0x19e5   :  { %2786 = vsyncadd [#allocation4], 4294966272 }
0x19e6   :  { %1998 = vsyncpa [#allocation3], 1 }
0x19e7   :  { %1999 = vsyncpa [#allocation6], 1 }
0x19e8   :  { %2000 = vsyncpa [#allocation9], 1 }
0x19e9   :  { %2001 = vsyncpa [#allocation12], 1 }
0x19ea   :  { %2002 = vsyncpa [#allocation4], 1 }

</bundles_post_ra>
